<compile_context>
chip_gen: v5e
topology: v5e:2x2
jax: 0.10.0
libtpu: 0.0.40
codegen_flags: <defaults>
</compile_context>

<pallas_src>
import jax
import jax.numpy as jnp
from jax.experimental import pallas as pl
from jax.experimental.pallas import tpu as pltpu

HIGHEST = jax.lax.Precision.HIGHEST  # one-time wrapper precomputes / reference only


def _lstm_update(gates, c, H):
    # gate columns pre-permuted in the wrapper to (i, f, o, g)
    sig = jax.nn.sigmoid(gates[:, :3 * H])      # i, f, o in one EUP push
    g = jnp.tanh(gates[:, 3 * H:])
    i, f, o = sig[:, :H], sig[:, H:2 * H], sig[:, 2 * H:]
    c_new = f * c + i * g
    h_new = o * jnp.tanh(c_new)
    return h_new, c_new


def speller_step_kernel(gx_ref, kproj_ref, val_ref, ebias_ref,
                        wac_ref, wah_ref, wbx_ref, wbh_ref, bb_ref,
                        hb_out_ref, ctx_out_ref,
                        ha_ref, ca_ref, hb_ref, cb_ref, ctx_ref):
    """One decode step per grid point; grid = (batch_blocks, LAL)."""
    t = pl.program_id(1)
    H = ha_ref.shape[1]

    @pl.when(t == 0)
    def _():
        ha_ref[...] = jnp.zeros_like(ha_ref)
        ca_ref[...] = jnp.zeros_like(ca_ref)
        hb_ref[...] = jnp.zeros_like(hb_ref)
        cb_ref[...] = jnp.zeros_like(cb_ref)
        ctx_ref[...] = jnp.zeros_like(ctx_ref)

    ctx = ctx_ref[...]
    h_a = ha_ref[...]
    # LSTM-A: token-side gates (embedding @ W_ih_a[:EMB] + b_a) precomputed in the
    # wrapper (gx, ba already folded); recurrent/context sides as two accumulated
    # dots (no per-step lane concat).
    gates_a = (gx_ref[0].astype(jnp.float32)
               + jnp.dot(ctx, wac_ref[...], preferred_element_type=jnp.float32)
               + jnp.dot(h_a, wah_ref[...], preferred_element_type=jnp.float32))
    h_a, c_a = _lstm_update(gates_a, ca_ref[...], H)
    ha_ref[...] = h_a
    ca_ref[...] = c_a

    h_b = hb_ref[...]
    gates_b = (bb_ref[...]
               + jnp.dot(h_a, wbx_ref[...], preferred_element_type=jnp.float32)
               + jnp.dot(h_b, wbh_ref[...], preferred_element_type=jnp.float32))
    h_b, c_b = _lstm_update(gates_b, cb_ref[...], H)
    hb_ref[...] = h_b
    cb_ref[...] = c_b

    # Dot-product attention with masked softmax; the query projection is folded
    # into kproj / ebias in the wrapper, so there is no per-step query matmul.
    # TODO(synk): at realistic RAL/HFS/CS switch these reductions to lax.dot_general
    #   batched matmuls so they land on the MXU instead of VALU+XLU.
    energy = (jnp.sum(kproj_ref[...].astype(jnp.float32) * h_b[:, None, :], axis=-1)
              + ebias_ref[...])
    p = jnp.exp(energy - jnp.max(energy, axis=-1, keepdims=True))
    att = p * pl.reciprocal(jnp.sum(p, axis=-1, keepdims=True), approx=True)
    ctx = jnp.sum(att[:, :, None] * val_ref[...].astype(jnp.float32), axis=1)
    ctx_ref[...] = ctx

    # Emit per-step (h_b, context); the vocab head is hoisted into a second,
    # fully parallel kernel (big-M matmul) off the serial critical path.
    hb_out_ref[0] = h_b.astype(hb_out_ref.dtype)
    ctx_out_ref[0] = ctx.astype(ctx_out_ref.dtype)


def char_head_kernel(hb_ref, ctx_ref, wch_ref, wcc_ref, bc_ref, out_ref):
    # Hoisted character head: logits = h_b @ Wch + ctx @ Wcc + bc (split weights,
    # no lane concat), M = LAL*BS_pad rows -> near-full MXU utilization.
    out_ref[...] = (
        jnp.dot(hb_ref[...], wch_ref[...], preferred_element_type=jnp.float32)
        + jnp.dot(ctx_ref[...], wcc_ref[...], preferred_element_type=jnp.float32)
        + bc_ref[...])


def _pick_tile(total, preferred, quantum):
    t = max(quantum, (min(total, preferred) // quantum) * quantum)
    while total % t:
        t -= quantum
    return t


def speller_forward(params, key_arr, val_arr, y, mask):
    BS, RAL, CS = key_arr.shape
    LAL = y.shape[1]
    VOC, EMB = params["emb"].shape
    HFS = params["whh_a"].shape[1]
    G4 = 4 * HFS

    # --- batch tiling: sublane-aligned; prefer >=2 blocks when batch allows (v7x 2 TCs) ---
    BS8 = 8 * ((BS + 7) // 8)
    BT = min(64, BS8)
    if BS8 // BT < 2 and BS8 >= 16:
        BT = max(8, ((BS8 // 2) // 8) * 8)
    BS_pad = BT * ((BS8 + BT - 1) // BT)
    NB = BS_pad // BT
    VOC_pad = 128 * ((VOC + 127) // 128)          # lane-dense head stores

    # --- gate-column permutation: PyTorch (i, f, g, o) -> (i, f, o, g) ---
    perm = jnp.concatenate([jnp.arange(0, HFS), jnp.arange(HFS, 2 * HFS),
                            jnp.arange(3 * HFS, 4 * HFS), jnp.arange(2 * HFS, 3 * HFS)])

    wih_a = params["wih_a"].T[:, perm]            # (EMB+CS, 4H)
    wa_e, wac = wih_a[:EMB], wih_a[EMB:]          # token rows / context rows
    wah = params["whh_a"].T[:, perm]              # (HFS, 4H)
    ba = (params["bih_a"] + params["bhh_a"])[perm].reshape(1, -1)
    wbx = params["wih_b"].T[:, perm]              # (HFS, 4H)
    wbh = params["whh_b"].T[:, perm]              # (HFS, 4H)
    bb = jnp.tile((params["bih_b"] + params["bhh_b"])[perm].reshape(1, -1), (BT, 1))

    wc_t = jnp.pad(params["wc"].T, ((0, 0), (0, VOC_pad - VOC)))   # (HFS+CS, VOCp)
    wch = wc_t[:HFS].astype(jnp.bfloat16)
    wcc = wc_t[HFS:].astype(jnp.bfloat16)
    bc = jnp.pad(params["bc"], (0, VOC_pad - VOC)).reshape(1, -1)  # (1, VOCp), f32

    # --- hoisted token-side matmul (+ folded b_a), time-major, bf16 ---
    emb_tm = params["emb"][y.T]                                    # (LAL, BS, EMB)
    gx = jnp.einsum('lbe,eg->lbg', emb_tm, wa_e, precision=HIGHEST) + ba
    gx = jnp.pad(gx, ((0, 0), (0, BS_pad - BS), (0, 0))).astype(jnp.bfloat16)

    # --- query projection folded into the key: kproj (bf16), ebias (f32, keeps -1e9 mask) ---
    key_pad = jnp.pad(key_arr, ((0, BS_pad - BS), (0, 0), (0, 0)))
    val_pad = jnp.pad(val_arr, ((0, BS_pad - BS), (0, 0), (0, 0))).astype(jnp.bfloat16)
    mask_pad = jnp.pad(mask, ((0, BS_pad - BS), (0, 0)), constant_values=1.0)
    kproj = jnp.einsum('brc,ch->brh', key_pad, params["wq"],
                       precision=HIGHEST).astype(jnp.bfloat16)
    ebias = (jnp.einsum('brc,c->br', key_pad, params["bq"], precision=HIGHEST)
             + (1.0 - mask_pad) * (-1e9))

    # --- serial recurrence: grid = (batch blocks, decode steps), state in VMEM scratch ---
    hb_seq, ctx_seq = pl.pallas_call(
        speller_step_kernel,
        out_shape=(jax.ShapeDtypeStruct((LAL, BS_pad, HFS), jnp.bfloat16),
                   jax.ShapeDtypeStruct((LAL, BS_pad, CS), jnp.bfloat16)),
        grid=(NB, LAL),
        in_specs=[
            pl.BlockSpec((1, BT, G4), lambda b, t: (t, b, 0)),       # gx, per-step slab
            pl.BlockSpec((BT, RAL, HFS), lambda b, t: (b, 0, 0)),    # kproj, LAL-invariant
            pl.BlockSpec((BT, RAL, CS), lambda b, t: (b, 0, 0)),     # val, LAL-invariant
            pl.BlockSpec((BT, RAL), lambda b, t: (b, 0)),            # ebias
            pl.BlockSpec((CS, G4), lambda b, t: (0, 0)),             # W_a (context rows)
            pl.BlockSpec((HFS, G4), lambda b, t: (0, 0)),            # W_a (h_a rows)
            pl.BlockSpec((HFS, G4), lambda b, t: (0, 0)),            # W_b (h_a rows)
            pl.BlockSpec((HFS, G4), lambda b, t: (0, 0)),            # W_b (h_b rows)
            pl.BlockSpec((BT, G4), lambda b, t: (0, 0)),             # bb (pre-broadcast)
        ],
        out_specs=(pl.BlockSpec((1, BT, HFS), lambda b, t: (t, b, 0)),
                   pl.BlockSpec((1, BT, CS), lambda b, t: (t, b, 0))),
        scratch_shapes=[
            pltpu.VMEM((BT, HFS), jnp.float32),   # h_a
            pltpu.VMEM((BT, HFS), jnp.float32),   # c_a
            pltpu.VMEM((BT, HFS), jnp.float32),   # h_b
            pltpu.VMEM((BT, HFS), jnp.float32),   # c_b
            pltpu.VMEM((BT, CS), jnp.float32),    # context
        ],
        compiler_params=pltpu.CompilerParams(
            dimension_semantics=("parallel", "arbitrary"),
            vmem_limit_bytes=32 * 1024 * 1024),
    )(gx, kproj, val_pad, ebias, wac, wah, wbx, wbh, bb)

    # --- hoisted character head: one big-M, fully parallel matmul over all steps ---
    M = LAL * BS_pad
    hb_flat = hb_seq.reshape(M, HFS)
    ctx_flat = ctx_seq.reshape(M, CS)
    TM = _pick_tile(M, 256, 8)
    TN = _pick_tile(VOC_pad, 512, 128)
    logits = pl.pallas_call(
        char_head_kernel,
        # NOTE: emit bf16 here instead if the downstream loss tolerates it
        # (halves the largest HBM writeback).
        out_shape=jax.ShapeDtypeStruct((M, VOC_pad), jnp.float32),
        grid=(M // TM, VOC_pad // TN),
        in_specs=[
            pl.BlockSpec((TM, HFS), lambda i, j: (i, 0)),
            pl.BlockSpec((TM, CS), lambda i, j: (i, 0)),
            pl.BlockSpec((HFS, TN), lambda i, j: (0, j)),
            pl.BlockSpec((CS, TN), lambda i, j: (0, j)),
            pl.BlockSpec((1, TN), lambda i, j: (0, j)),
        ],
        out_specs=pl.BlockSpec((TM, TN), lambda i, j: (i, j)),
        compiler_params=pltpu.CompilerParams(
            dimension_semantics=("parallel", "parallel"),
            vmem_limit_bytes=32 * 1024 * 1024),
    )(hb_flat, ctx_flat, wch, wcc, bc)

    pred = logits.reshape(LAL, BS_pad, VOC_pad)[:, :BS, :VOC]   # drop padding
    return jnp.transpose(pred, (1, 0, 2))                       # (BS, LAL, VOC)


def speller_reference(params, key_arr, val_arr, y, mask):
    """Pure-JAX reference mirroring the PyTorch forward (teacher-forced path)."""
    BS, RAL, CS = key_arr.shape
    LAL = y.shape[1]
    HFS = params["whh_a"].shape[1]
    h_a = c_a = h_b = c_b = jnp.zeros((BS, HFS), jnp.float32)
    ctx = jnp.zeros((BS, CS), jnp.float32)
    dot = lambda a, b: jnp.dot(a, b, precision=HIGHEST)

    def cell(x, h, c, wih, whh, bih, bhh):
        gates = dot(x, wih.T) + dot(h, whh.T) + bih + bhh
        i, f, g, o = jnp.split(gates, 4, axis=1)
        c_new = jax.nn.sigmoid(f) * c + jax.nn.sigmoid(i) * jnp.tanh(g)
        h_new = jax.nn.sigmoid(o) * jnp.tanh(c_new)
        return h_new, c_new

    preds = []
    for t in range(LAL):
        emb = params["emb"][y[:, t]]
        x = jnp.concatenate([emb, ctx], axis=1)
        h_a, c_a = cell(x, h_a, c_a, params["wih_a"], params["whh_a"],
                        params["bih_a"], params["bhh_a"])
        h_b, c_b = cell(h_a, h_b, c_b, params["wih_b"], params["whh_b"],
                        params["bih_b"], params["bhh_b"])
        query = dot(h_b, params["wq"].T) + params["bq"]
        energy = jnp.einsum('brc,bc->br', key_arr, query, precision=HIGHEST)
        energy = energy + (1.0 - mask) * (-1e9)
        att = jax.nn.softmax(energy, axis=-1)
        ctx = jnp.einsum('br,brc->bc', att, val_arr, precision=HIGHEST)
        logits = dot(jnp.concatenate([h_b, ctx], axis=1), params["wc"].T) + params["bc"]
        preds.append(logits)
    return jnp.stack(preds, axis=1)


if __name__ == "__main__":
    CS, VOC, HFS, EMB = 32, 32, 32, 32
    BS, RAL, LAL = 4, 16, 8

    rng = jax.random.PRNGKey(0)
    keys = jax.random.split(rng, 20)

    def uni(k, shape, fan):
        bound = 1.0 / (fan ** 0.5)
        return jax.random.uniform(k, shape, jnp.float32, -bound, bound)

    # deterministic synthetic parameters (PyTorch-default-like init)
    params = {
        "emb":   jax.random.normal(keys[0], (VOC, EMB), jnp.float32),
        "wih_a": uni(keys[1], (4 * HFS, EMB + CS), HFS),
        "whh_a": uni(keys[2], (4 * HFS, HFS), HFS),
        "bih_a": uni(keys[3], (4 * HFS,), HFS),
        "bhh_a": uni(keys[4], (4 * HFS,), HFS),
        "wih_b": uni(keys[5], (4 * HFS, HFS), HFS),
        "whh_b": uni(keys[6], (4 * HFS, HFS), HFS),
        "bih_b": uni(keys[7], (4 * HFS,), HFS),
        "bhh_b": uni(keys[8], (4 * HFS,), HFS),
        "wq":    uni(keys[9], (CS, HFS), HFS),
        "bq":    uni(keys[10], (CS,), HFS),
        "wc":    uni(keys[11], (VOC, HFS + CS), HFS + CS),
        "bc":    uni(keys[12], (VOC,), HFS + CS),
    }

    key_arr = jax.random.normal(keys[13], (BS, RAL, CS), jnp.float32)
    val_arr = jax.random.normal(keys[14], (BS, RAL, CS), jnp.float32)
    y = jax.random.randint(keys[15], (BS, LAL), 0, VOC)
    mask = jnp.ones((BS, RAL), jnp.float32)
    mask = mask.at[2:, RAL - 4:].set(0.0)   # pad out the tail of two utterances

    pred = jax.block_until_ready(speller_forward(params, key_arr, val_arr, y, mask))
    ref = speller_reference(params, key_arr, val_arr, y, mask)

    assert pred.shape == (BS, LAL, VOC), pred.shape
    # kernel matmuls run at default (bf16 MXU) precision and large operands are bf16
    # per perf review; reference is full f32 (HIGHEST), hence the looser tolerance.
    max_err = float(jnp.max(jnp.abs(pred - ref)))
    assert max_err < 1e-1, f"max abs error too large: {max_err}"
    print("KERNEL_OK")
</pallas_src>

<mosaic_0001>
module attributes {stable_mosaic.version = 11 : i64} {
  func.func @speller_step_kernel(%arg0: i32, %arg1: i32, %arg2: memref<1x8x128xbf16, #tpu.memory_space<vmem>>, %arg3: memref<8x16x32xbf16, #tpu.memory_space<vmem>>, %arg4: memref<8x16x32xbf16, #tpu.memory_space<vmem>>, %arg5: memref<8x16xf32, #tpu.memory_space<vmem>>, %arg6: memref<32x128xf32, #tpu.memory_space<vmem>>, %arg7: memref<32x128xf32, #tpu.memory_space<vmem>>, %arg8: memref<32x128xf32, #tpu.memory_space<vmem>>, %arg9: memref<32x128xf32, #tpu.memory_space<vmem>>, %arg10: memref<8x128xf32, #tpu.memory_space<vmem>>, %arg11: memref<1x8x32xbf16, #tpu.memory_space<vmem>>, %arg12: memref<1x8x32xbf16, #tpu.memory_space<vmem>>, %arg13: memref<8x32xf32, #tpu.memory_space<vmem>>, %arg14: memref<8x32xf32, #tpu.memory_space<vmem>>, %arg15: memref<8x32xf32, #tpu.memory_space<vmem>>, %arg16: memref<8x32xf32, #tpu.memory_space<vmem>>, %arg17: memref<8x32xf32, #tpu.memory_space<vmem>>) attributes {dimension_semantics = [#tpu.dimension_semantics<parallel>, #tpu.dimension_semantics<arbitrary>], iteration_bounds = array<i64: 1, 8>, scalar_prefetch = 0 : i64, scratch_operands = 5 : i64, tpu.core_type = #tpu.core_type<tc>, window_params = [{transform_indices = @transform_0, window_bounds = array<i64: 1, 8, 128>}, {transform_indices = @transform_1, window_bounds = array<i64: 8, 16, 32>}, {transform_indices = @transform_2, window_bounds = array<i64: 8, 16, 32>}, {transform_indices = @transform_3, window_bounds = array<i64: 8, 16>}, {pipeline_mode = #tpu.pipeline_mode<synchronous>, transform_indices = @transform_4, window_bounds = array<i64: 32, 128>}, {pipeline_mode = #tpu.pipeline_mode<synchronous>, transform_indices = @transform_5, window_bounds = array<i64: 32, 128>}, {pipeline_mode = #tpu.pipeline_mode<synchronous>, transform_indices = @transform_6, window_bounds = array<i64: 32, 128>}, {pipeline_mode = #tpu.pipeline_mode<synchronous>, transform_indices = @transform_7, window_bounds = array<i64: 32, 128>}, {pipeline_mode = #tpu.pipeline_mode<synchronous>, transform_indices = @transform_8, window_bounds = array<i64: 8, 128>}, {transform_indices = @transform_9, window_bounds = array<i64: 1, 8, 32>}, {transform_indices = @transform_10, window_bounds = array<i64: 1, 8, 32>}]} {
    %c0_i32 = arith.constant 0 : i32
    %0 = arith.cmpi eq, %arg1, %c0_i32 : i32
    %1 = arith.extui %0 : i1 to i32
    %c0_i32_0 = arith.constant 0 : i32
    %2 = arith.cmpi ne, %1, %c0_i32_0 : i32
    scf.if %2 {
      %cst_56 = arith.constant 0.000000e+00 : f32
      %93 = vector.broadcast %cst_56 : f32 to vector<8x32xf32>
      %c0_57 = arith.constant 0 : index
      %c0_58 = arith.constant 0 : index
      %94 = vector.load %arg13[%c0_57, %c0_58] : memref<8x32xf32, #tpu.memory_space<vmem>>, vector<8x32xf32>
      tpu.vector_store %arg13[%c0_57, %c0_58], %93 {strides = array<i32>} : memref<8x32xf32, #tpu.memory_space<vmem>>, vector<8x32xf32>,
      %cst_59 = arith.constant 0.000000e+00 : f32
      %95 = vector.broadcast %cst_59 : f32 to vector<8x32xf32>
      %c0_60 = arith.constant 0 : index
      %c0_61 = arith.constant 0 : index
      %96 = vector.load %arg14[%c0_60, %c0_61] : memref<8x32xf32, #tpu.memory_space<vmem>>, vector<8x32xf32>
      tpu.vector_store %arg14[%c0_60, %c0_61], %95 {strides = array<i32>} : memref<8x32xf32, #tpu.memory_space<vmem>>, vector<8x32xf32>,
      %cst_62 = arith.constant 0.000000e+00 : f32
      %97 = vector.broadcast %cst_62 : f32 to vector<8x32xf32>
      %c0_63 = arith.constant 0 : index
      %c0_64 = arith.constant 0 : index
      %98 = vector.load %arg15[%c0_63, %c0_64] : memref<8x32xf32, #tpu.memory_space<vmem>>, vector<8x32xf32>
      tpu.vector_store %arg15[%c0_63, %c0_64], %97 {strides = array<i32>} : memref<8x32xf32, #tpu.memory_space<vmem>>, vector<8x32xf32>,
      %cst_65 = arith.constant 0.000000e+00 : f32
      %99 = vector.broadcast %cst_65 : f32 to vector<8x32xf32>
      %c0_66 = arith.constant 0 : index
      %c0_67 = arith.constant 0 : index
      %100 = vector.load %arg16[%c0_66, %c0_67] : memref<8x32xf32, #tpu.memory_space<vmem>>, vector<8x32xf32>
      tpu.vector_store %arg16[%c0_66, %c0_67], %99 {strides = array<i32>} : memref<8x32xf32, #tpu.memory_space<vmem>>, vector<8x32xf32>,
      %cst_68 = arith.constant 0.000000e+00 : f32
      %101 = vector.broadcast %cst_68 : f32 to vector<8x32xf32>
      %c0_69 = arith.constant 0 : index
      %c0_70 = arith.constant 0 : index
      %102 = vector.load %arg17[%c0_69, %c0_70] : memref<8x32xf32, #tpu.memory_space<vmem>>, vector<8x32xf32>
      tpu.vector_store %arg17[%c0_69, %c0_70], %101 {strides = array<i32>} : memref<8x32xf32, #tpu.memory_space<vmem>>, vector<8x32xf32>,
    } else {
    }
    %c0 = arith.constant 0 : index
    %c0_1 = arith.constant 0 : index
    %3 = vector.load %arg17[%c0, %c0_1] : memref<8x32xf32, #tpu.memory_space<vmem>>, vector<8x32xf32>
    %c0_2 = arith.constant 0 : index
    %c0_3 = arith.constant 0 : index
    %4 = vector.load %arg13[%c0_2, %c0_3] : memref<8x32xf32, #tpu.memory_space<vmem>>, vector<8x32xf32>
    %c0_4 = arith.constant 0 : index
    %c0_5 = arith.constant 0 : index
    %c0_6 = arith.constant 0 : index
    %5 = vector.load %arg2[%c0_4, %c0_5, %c0_6] : memref<1x8x128xbf16, #tpu.memory_space<vmem>>, vector<1x8x128xbf16>
    %6 = vector.shape_cast %5 : vector<1x8x128xbf16> to vector<8x128xbf16>
    %7 = arith.extf %6 : vector<8x128xbf16> to vector<8x128xf32>
    %c0_7 = arith.constant 0 : index
    %c0_8 = arith.constant 0 : index
    %8 = vector.load %arg6[%c0_7, %c0_8] : memref<32x128xf32, #tpu.memory_space<vmem>>, vector<32x128xf32>
    %cst = arith.constant dense<0.000000e+00> : vector<8x128xf32>
    %9 = tpu.matmul %3, %8, %cst {dimension_numbers = #tpu.dot_dimension_numbers<[1], [0], [0], [1], [0, 0, 1, 1], [], []>} : vector<8x32xf32>, vector<32x128xf32>, vector<8x128xf32> -> vector<8x128xf32>
    %10 = arith.addf %7, %9 : vector<8x128xf32>
    %c0_9 = arith.constant 0 : index
    %c0_10 = arith.constant 0 : index
    %11 = vector.load %arg7[%c0_9, %c0_10] : memref<32x128xf32, #tpu.memory_space<vmem>>, vector<32x128xf32>
    %cst_11 = arith.constant dense<0.000000e+00> : vector<8x128xf32>
    %12 = tpu.matmul %4, %11, %cst_11 {dimension_numbers = #tpu.dot_dimension_numbers<[1], [0], [0], [1], [0, 0, 1, 1], [], []>} : vector<8x32xf32>, vector<32x128xf32>, vector<8x128xf32> -> vector<8x128xf32>
    %13 = arith.addf %10, %12 : vector<8x128xf32>
    %c0_12 = arith.constant 0 : index
    %c0_13 = arith.constant 0 : index
    %14 = vector.load %arg14[%c0_12, %c0_13] : memref<8x32xf32, #tpu.memory_space<vmem>>, vector<8x32xf32>
    %15 = vector.extract_strided_slice %13 {offsets = [0, 0], sizes = [8, 96], strides = [1, 1]} : vector<8x128xf32> to vector<8x96xf32>
    %16 = arith.negf %15 : vector<8x96xf32>
    %17 = math.exp %16 : vector<8x96xf32>
    %cst_14 = arith.constant 1.000000e+00 : f32
    %18 = vector.broadcast %cst_14 : f32 to vector<8x96xf32>
    %19 = arith.addf %18, %17 : vector<8x96xf32>
    %20 = arith.divf %18, %19 : vector<8x96xf32>
    %21 = vector.extract_strided_slice %13 {offsets = [0, 96], sizes = [8, 32], strides = [1, 1]} : vector<8x128xf32> to vector<8x32xf32>
    %22 = math.tanh %21 : vector<8x32xf32>
    %23 = vector.extract_strided_slice %20 {offsets = [0, 0], sizes = [8, 32], strides = [1, 1]} : vector<8x96xf32> to vector<8x32xf32>
    %24 = vector.extract_strided_slice %20 {offsets = [0, 32], sizes = [8, 32], strides = [1, 1]} : vector<8x96xf32> to vector<8x32xf32>
    %25 = vector.extract_strided_slice %20 {offsets = [0, 64], sizes = [8, 32], strides = [1, 1]} : vector<8x96xf32> to vector<8x32xf32>
    %26 = arith.mulf %24, %14 : vector<8x32xf32>
    %27 = arith.mulf %23, %22 : vector<8x32xf32>
    %28 = arith.addf %26, %27 : vector<8x32xf32>
    %29 = math.tanh %28 : vector<8x32xf32>
    %30 = arith.mulf %25, %29 : vector<8x32xf32>
    %c0_15 = arith.constant 0 : index
    %c0_16 = arith.constant 0 : index
    %31 = vector.load %arg13[%c0_15, %c0_16] : memref<8x32xf32, #tpu.memory_space<vmem>>, vector<8x32xf32>
    tpu.vector_store %arg13[%c0_15, %c0_16], %30 {strides = array<i32>} : memref<8x32xf32, #tpu.memory_space<vmem>>, vector<8x32xf32>,
    %c0_17 = arith.constant 0 : index
    %c0_18 = arith.constant 0 : index
    %32 = vector.load %arg14[%c0_17, %c0_18] : memref<8x32xf32, #tpu.memory_space<vmem>>, vector<8x32xf32>
    tpu.vector_store %arg14[%c0_17, %c0_18], %28 {strides = array<i32>} : memref<8x32xf32, #tpu.memory_space<vmem>>, vector<8x32xf32>,
    %c0_19 = arith.constant 0 : index
    %c0_20 = arith.constant 0 : index
    %33 = vector.load %arg15[%c0_19, %c0_20] : memref<8x32xf32, #tpu.memory_space<vmem>>, vector<8x32xf32>
    %c0_21 = arith.constant 0 : index
    %c0_22 = arith.constant 0 : index
    %34 = vector.load %arg10[%c0_21, %c0_22] : memref<8x128xf32, #tpu.memory_space<vmem>>, vector<8x128xf32>
    %c0_23 = arith.constant 0 : index
    %c0_24 = arith.constant 0 : index
    %35 = vector.load %arg8[%c0_23, %c0_24] : memref<32x128xf32, #tpu.memory_space<vmem>>, vector<32x128xf32>
    %cst_25 = arith.constant dense<0.000000e+00> : vector<8x128xf32>
    %36 = tpu.matmul %30, %35, %cst_25 {dimension_numbers = #tpu.dot_dimension_numbers<[1], [0], [0], [1], [0, 0, 1, 1], [], []>} : vector<8x32xf32>, vector<32x128xf32>, vector<8x128xf32> -> vector<8x128xf32>
    %37 = arith.addf %34, %36 : vector<8x128xf32>
    %c0_26 = arith.constant 0 : index
    %c0_27 = arith.constant 0 : index
    %38 = vector.load %arg9[%c0_26, %c0_27] : memref<32x128xf32, #tpu.memory_space<vmem>>, vector<32x128xf32>
    %cst_28 = arith.constant dense<0.000000e+00> : vector<8x128xf32>
    %39 = tpu.matmul %33, %38, %cst_28 {dimension_numbers = #tpu.dot_dimension_numbers<[1], [0], [0], [1], [0, 0, 1, 1], [], []>} : vector<8x32xf32>, vector<32x128xf32>, vector<8x128xf32> -> vector<8x128xf32>
    %40 = arith.addf %37, %39 : vector<8x128xf32>
    %c0_29 = arith.constant 0 : index
    %c0_30 = arith.constant 0 : index
    %41 = vector.load %arg16[%c0_29, %c0_30] : memref<8x32xf32, #tpu.memory_space<vmem>>, vector<8x32xf32>
    %42 = vector.extract_strided_slice %40 {offsets = [0, 0], sizes = [8, 96], strides = [1, 1]} : vector<8x128xf32> to vector<8x96xf32>
    %43 = arith.negf %42 : vector<8x96xf32>
    %44 = math.exp %43 : vector<8x96xf32>
    %cst_31 = arith.constant 1.000000e+00 : f32
    %45 = vector.broadcast %cst_31 : f32 to vector<8x96xf32>
    %46 = arith.addf %45, %44 : vector<8x96xf32>
    %47 = arith.divf %45, %46 : vector<8x96xf32>
    %48 = vector.extract_strided_slice %40 {offsets = [0, 96], sizes = [8, 32], strides = [1, 1]} : vector<8x128xf32> to vector<8x32xf32>
    %49 = math.tanh %48 : vector<8x32xf32>
    %50 = vector.extract_strided_slice %47 {offsets = [0, 0], sizes = [8, 32], strides = [1, 1]} : vector<8x96xf32> to vector<8x32xf32>
    %51 = vector.extract_strided_slice %47 {offsets = [0, 32], sizes = [8, 32], strides = [1, 1]} : vector<8x96xf32> to vector<8x32xf32>
    %52 = vector.extract_strided_slice %47 {offsets = [0, 64], sizes = [8, 32], strides = [1, 1]} : vector<8x96xf32> to vector<8x32xf32>
    %53 = arith.mulf %51, %41 : vector<8x32xf32>
    %54 = arith.mulf %50, %49 : vector<8x32xf32>
    %55 = arith.addf %53, %54 : vector<8x32xf32>
    %56 = math.tanh %55 : vector<8x32xf32>
    %57 = arith.mulf %52, %56 : vector<8x32xf32>
    %c0_32 = arith.constant 0 : index
    %c0_33 = arith.constant 0 : index
    %58 = vector.load %arg15[%c0_32, %c0_33] : memref<8x32xf32, #tpu.memory_space<vmem>>, vector<8x32xf32>
    tpu.vector_store %arg15[%c0_32, %c0_33], %57 {strides = array<i32>} : memref<8x32xf32, #tpu.memory_space<vmem>>, vector<8x32xf32>,
    %c0_34 = arith.constant 0 : index
    %c0_35 = arith.constant 0 : index
    %59 = vector.load %arg16[%c0_34, %c0_35] : memref<8x32xf32, #tpu.memory_space<vmem>>, vector<8x32xf32>
    tpu.vector_store %arg16[%c0_34, %c0_35], %55 {strides = array<i32>} : memref<8x32xf32, #tpu.memory_space<vmem>>, vector<8x32xf32>,
    %c0_36 = arith.constant 0 : index
    %c0_37 = arith.constant 0 : index
    %c0_38 = arith.constant 0 : index
    %60 = vector.load %arg3[%c0_36, %c0_37, %c0_38] : memref<8x16x32xbf16, #tpu.memory_space<vmem>>, vector<8x16x32xbf16>
    %61 = arith.extf %60 : vector<8x16x32xbf16> to vector<8x16x32xf32>
    %62 = vector.shape_cast %57 : vector<8x32xf32> to vector<8x1x32xf32>
    %63 = vector.broadcast %62 : vector<8x1x32xf32> to vector<8x16x32xf32>
    %64 = arith.mulf %61, %63 : vector<8x16x32xf32>
    %cst_39 = arith.constant dense<0.000000e+00> : vector<8x16xf32>
    %65 = vector.multi_reduction <add>, %64, %cst_39 [2] : vector<8x16x32xf32> to vector<8x16xf32>
    %c0_40 = arith.constant 0 : index
    %c0_41 = arith.constant 0 : index
    %66 = vector.load %arg5[%c0_40, %c0_41] : memref<8x16xf32, #tpu.memory_space<vmem>>, vector<8x16xf32>
    %67 = arith.addf %65, %66 : vector<8x16xf32>
    %cst_42 = arith.constant dense<0xFF800000> : vector<8xf32>
    %68 = vector.multi_reduction <maximumf>, %67, %cst_42 [1] : vector<8x16xf32> to vector<8xf32>
    %69 = vector.shape_cast %68 : vector<8xf32> to vector<8x1xf32>
    %70 = vector.broadcast %69 : vector<8x1xf32> to vector<8x16xf32>
    %71 = arith.subf %67, %70 : vector<8x16xf32>
    %72 = math.exp %71 : vector<8x16xf32>
    %cst_43 = arith.constant dense<0.000000e+00> : vector<8xf32>
    %73 = vector.multi_reduction <add>, %72, %cst_43 [1] : vector<8x16xf32> to vector<8xf32>
    %74 = vector.shape_cast %73 : vector<8xf32> to vector<8x1xf32>
    %75 = tpu.reciprocal %74 {approx = true} : vector<8x1xf32> -> vector<8x1xf32>
    %76 = vector.broadcast %75 : vector<8x1xf32> to vector<8x16xf32>
    %77 = arith.mulf %72, %76 : vector<8x16xf32>
    %78 = vector.shape_cast %77 : vector<8x16xf32> to vector<8x16x1xf32>
    %c0_44 = arith.constant 0 : index
    %c0_45 = arith.constant 0 : index
    %c0_46 = arith.constant 0 : index
    %79 = vector.load %arg4[%c0_44, %c0_45, %c0_46] : memref<8x16x32xbf16, #tpu.memory_space<vmem>>, vector<8x16x32xbf16>
    %80 = arith.extf %79 : vector<8x16x32xbf16> to vector<8x16x32xf32>
    %81 = vector.broadcast %78 : vector<8x16x1xf32> to vector<8x16x32xf32>
    %82 = arith.mulf %81, %80 : vector<8x16x32xf32>
    %cst_47 = arith.constant dense<0.000000e+00> : vector<8x32xf32>
    %83 = vector.multi_reduction <add>, %82, %cst_47 [1] : vector<8x16x32xf32> to vector<8x32xf32>
    %c0_48 = arith.constant 0 : index
    %c0_49 = arith.constant 0 : index
    %84 = vector.load %arg17[%c0_48, %c0_49] : memref<8x32xf32, #tpu.memory_space<vmem>>, vector<8x32xf32>
    tpu.vector_store %arg17[%c0_48, %c0_49], %83 {strides = array<i32>} : memref<8x32xf32, #tpu.memory_space<vmem>>, vector<8x32xf32>,
    %85 = arith.truncf %57 : vector<8x32xf32> to vector<8x32xbf16>
    %c0_50 = arith.constant 0 : index
    %c0_51 = arith.constant 0 : index
    %c0_52 = arith.constant 0 : index
    %86 = vector.load %arg11[%c0_50, %c0_51, %c0_52] : memref<1x8x32xbf16, #tpu.memory_space<vmem>>, vector<1x8x32xbf16>
    %87 = vector.shape_cast %86 : vector<1x8x32xbf16> to vector<8x32xbf16>
    %88 = vector.shape_cast %85 : vector<8x32xbf16> to vector<1x8x32xbf16>
    tpu.vector_store %arg11[%c0_50, %c0_51, %c0_52], %88 {strides = array<i32>} : memref<1x8x32xbf16, #tpu.memory_space<vmem>>, vector<1x8x32xbf16>,
    %89 = arith.truncf %83 : vector<8x32xf32> to vector<8x32xbf16>
    %c0_53 = arith.constant 0 : index
    %c0_54 = arith.constant 0 : index
    %c0_55 = arith.constant 0 : index
    %90 = vector.load %arg12[%c0_53, %c0_54, %c0_55] : memref<1x8x32xbf16, #tpu.memory_space<vmem>>, vector<1x8x32xbf16>
    %91 = vector.shape_cast %90 : vector<1x8x32xbf16> to vector<8x32xbf16>
    %92 = vector.shape_cast %89 : vector<8x32xbf16> to vector<1x8x32xbf16>
    tpu.vector_store %arg12[%c0_53, %c0_54, %c0_55], %92 {strides = array<i32>} : memref<1x8x32xbf16, #tpu.memory_space<vmem>>, vector<1x8x32xbf16>,
    return
  }
  func.func @transform_0(%arg0: i32, %arg1: i32) -> (i32, i32, i32) {
    %c0_i32 = arith.constant 0 : i32
    %c0_i32_0 = arith.constant 0 : i32
    return %arg1, %arg0, %c0_i32 : i32, i32, i32
  }
  func.func @transform_1(%arg0: i32, %arg1: i32) -> (i32, i32, i32) {
    %c0_i32 = arith.constant 0 : i32
    %c0_i32_0 = arith.constant 0 : i32
    %c0_i32_1 = arith.constant 0 : i32
    return %arg0, %c0_i32, %c0_i32_0 : i32, i32, i32
  }
  func.func @transform_2(%arg0: i32, %arg1: i32) -> (i32, i32, i32) {
    %c0_i32 = arith.constant 0 : i32
    %c0_i32_0 = arith.constant 0 : i32
    %c0_i32_1 = arith.constant 0 : i32
    return %arg0, %c0_i32, %c0_i32_0 : i32, i32, i32
  }
  func.func @transform_3(%arg0: i32, %arg1: i32) -> (i32, i32) {
    %c0_i32 = arith.constant 0 : i32
    %c0_i32_0 = arith.constant 0 : i32
    return %arg0, %c0_i32 : i32, i32
  }
  func.func @transform_4(%arg0: i32, %arg1: i32) -> (i32, i32) {
    %c0_i32 = arith.constant 0 : i32
    %c0_i32_0 = arith.constant 0 : i32
    %c0_i32_1 = arith.constant 0 : i32
    return %c0_i32, %c0_i32_0 : i32, i32
  }
  func.func @transform_5(%arg0: i32, %arg1: i32) -> (i32, i32) {
    %c0_i32 = arith.constant 0 : i32
    %c0_i32_0 = arith.constant 0 : i32
    %c0_i32_1 = arith.constant 0 : i32
    return %c0_i32, %c0_i32_0 : i32, i32
  }
  func.func @transform_6(%arg0: i32, %arg1: i32) -> (i32, i32) {
    %c0_i32 = arith.constant 0 : i32
    %c0_i32_0 = arith.constant 0 : i32
    %c0_i32_1 = arith.constant 0 : i32
    return %c0_i32, %c0_i32_0 : i32, i32
  }
  func.func @transform_7(%arg0: i32, %arg1: i32) -> (i32, i32) {
    %c0_i32 = arith.constant 0 : i32
    %c0_i32_0 = arith.constant 0 : i32
    %c0_i32_1 = arith.constant 0 : i32
    return %c0_i32, %c0_i32_0 : i32, i32
  }
  func.func @transform_8(%arg0: i32, %arg1: i32) -> (i32, i32) {
    %c0_i32 = arith.constant 0 : i32
    %c0_i32_0 = arith.constant 0 : i32
    %c0_i32_1 = arith.constant 0 : i32
    return %c0_i32, %c0_i32_0 : i32, i32
  }
  func.func @transform_9(%arg0: i32, %arg1: i32) -> (i32, i32, i32) {
    %c0_i32 = arith.constant 0 : i32
    %c0_i32_0 = arith.constant 0 : i32
    return %arg1, %arg0, %c0_i32 : i32, i32, i32
  }
  func.func @transform_10(%arg0: i32, %arg1: i32) -> (i32, i32, i32) {
    %c0_i32 = arith.constant 0 : i32
    %c0_i32_0 = arith.constant 0 : i32
    return %arg1, %arg0, %c0_i32 : i32, i32, i32
  }
}

</mosaic_0001>

<bundles_post_ra>
// kernel: tpu_custom_call.1
= control target key start
LH: loop header
LB: loop body
LE: loop exit
PB: predicated region body
PF: predicated region fallthrough
CT: control target
= control target key end

     0   :  { %s3272_s0 = inlined_call_operand.hbm [shape: bf16[8,8,128], index: 0, kind: input, shape index: {}]   ;;  %s3273_s1 = inlined_call_operand.hbm [shape: bf16[8,16,32], index: 1, kind: input, shape index: {}]   ;;  %s3274_s2 = inlined_call_operand.hbm [shape: bf16[8,16,32], index: 2, kind: input, shape index: {}]   ;;  %s3275_s3 = inlined_call_operand.hbm [shape: f32[8,16], index: 3, kind: input, shape index: {}]   ;;  %s3276_s4 = inlined_call_operand.hbm [shape: f32[32,128], index: 4, kind: input, shape index: {}]   ;;  %s3277_s5 = inlined_call_operand.hbm [shape: f32[32,128], index: 5, kind: input, shape index: {}]   ;;  %s3278_s6 = inlined_call_operand.hbm [shape: f32[32,128], index: 6, kind: input, shape index: {}]   ;;  %s3279_s7 = inlined_call_operand.hbm [shape: f32[32,128], index: 7, kind: input, shape index: {}]   ;;  %s3280_s8 = inlined_call_operand.hbm [shape: f32[8,128], index: 8, kind: input, shape index: {}]   ;;  %s3281_s9 = inlined_call_operand.hbm [shape: bf16[8,8,32], index: 9, kind: output, shape index: {0}]   ;;  %s3282_s10 = inlined_call_operand.hbm [shape: bf16[8,8,32], index: 10, kind: output, shape index: {1}]  }
   0x1   :  { %3286 = sst [smem:[#allocation32_spill]] %s3273_s1 }
   0x2   :  { %3287 = sst [smem:[#allocation33_spill]] %s3274_s2 }
   0x3   :  { %3288 = sst [smem:[#allocation34_spill]] %s3275_s3 }
   0x4   :  { %3289 = sst [smem:[#allocation35_spill]] %s3281_s9 }
   0x5   :  { %3290 = sst [smem:[#allocation36_spill]] %s3282_s10 }
   0x6   :  { %16 = vsyncpa [#allocation8], 0 }
   0x7   :  { %18 = vsyncpa [#allocation8 + $0x1], 0 }
   0x8   :  { %19 = vsyncpa [#allocation11], 0 }
   0x9   :  { %20 = vsyncpa [#allocation14], 0 }
   0xa   :  { %21 = vsyncpa [#allocation17], 0 }
   0xb   :  { %22 = vsyncpa [#allocation20], 0 }
   0xc   :  { %23 = vsyncpa [#allocation9], 0 }
   0xd   :  { %25 = vsyncpa [#allocation9 + $0x1], 0 }
   0xe   :  { %26 = vsyncpa [#allocation24], 0 }
   0xf   :  { %28 = vsyncpa [#allocation24 + $0x1], 0  ;;  %s2677_s13 = smov 0   ;;  %s2679_s14 = smov 0  }
  0x10   :  { %s2681_s15 = smov 0   ;;  %s2683_s16 = smov 0  }
  0x11   :  { %s2685_s17 = smov 0   ;;  %s2687_s18 = smov 0  }
  0x12 LB: > { %s3283_s19 = sadd.s32 4294967295, %s2603_s18   ;;  %p1869_p0 = scmp.ge.s32.totalorder %s2603_s18, 1  ;;  %s2603_s18 = sphi %s2687_s18, %s34_s18   ;;  %s2599_s17 = sphi %s2685_s17, %s3309_s17   ;;  %s2595_s16 = sphi %s2683_s16, %s3308_s16   ;;  %s2591_s15 = sphi %s2681_s15, %s3307_s15   ;;  %s2587_s14 = sphi %s2679_s14, %s3306_s14   ;;  %s2583_s13 = sphi %s2677_s13, %s3305_s13  }
  0x13   : > { %p2711_p1 = scmp.eq.s32.totalorder %s3283_s19, 0  ;;  %p318_p2 = scmp.lt.s32.totalorder %s2603_s18, 9 }
  0x14   : > { %s3292_s1 = sld [smem:[#allocation32_spill]]  ;;  %s2605_s25 = smov [#allocation10]  }
  0x15   : > { %p2719_p3 = pnand %p1869_p0, %p318_p2  ;;  %s335_s26 = sshll.u32 %s2605_s25, 4  ;;  %s336_s26 = int_to_ptr.vmem [resolvable:$true] %s335_s26 }
  0x16   : > { %s3295_s3 = sld [smem:[#allocation34_spill]]  ;;  %s2606_s11 = smov 64  }
  0x17   : > { %p2022_p4 = pneg %p2719_p3  ;;  %s2607_s12 = smov 4  }
  0x18   : > { %s2608_s21 = smov [#allocation13]   ;;  %s393_s28 = sshll.u32 %s3277_s5, 4  ;;  %s394_s28 = int_to_ptr.hbm [resolvable:$true] %s393_s28 }
  0x19   : > { %p2727_p5 = pnand %p2022_p4, %p2711_p1  ;;  %s370_s22 = sshll.u32 %s2608_s21, 4  ;;  %s371_s22 = int_to_ptr.vmem [resolvable:$true] %s370_s22 }
  0x1a   : > { %s333_s23 = sshll.u32 %s3292_s1, 4  ;;  %s2609_s29 = smov [#allocation16]   ;;  %s334_s23 = int_to_ptr.hbm [resolvable:$true] %s333_s23 }
  0x1b   : > { %2025 = dma.hbm_to_vmem [thread:$0]  (!%p2727_p5), %s334_s23, 1024, %s336_s26, [#allocation11], %s2606_s11, %s2606_s11, %s2607_s12  }
  0x1c   : > { %s368_s30 = sshll.u32 %s3295_s3, 4  ;;  %s395_s1 = sshll.u32 %s2609_s29, 4  ;;  %s369_s30 = int_to_ptr.hbm [resolvable:$true] %s368_s30  ;;  %s396_s1 = int_to_ptr.vmem [resolvable:$true] %s395_s1 }
  0x1d   : > { %2031 = dma.hbm_to_vmem [thread:$0]  (!%p2727_p5), %s369_s30, 128, %s371_s22, [#allocation14]  }
  0x1e   : > { %s421_s9 = sshll.u32 %s3279_s7, 4  ;;  %s2610_s23 = smov 128   ;;  %s422_s9 = int_to_ptr.hbm [resolvable:$true] %s421_s9 }
  0x1f   : > { %s2611_s26 = smov 8   ;;  %s2612_s19 = smov [#allocation19]  }
  0x20   : > { %2037 = dma.hbm_to_vmem [thread:$0]  (!%p2727_p5), %s394_s28, 512, %s396_s1, [#allocation17], %s2610_s23, %s2610_s23, %s2611_s26  }
  0x21   : > { %s423_s30 = sshll.u32 %s2612_s19, 4  ;;  %s3296_s2 = sld [smem:[#allocation33_spill]]  ;;  %s424_s30 = int_to_ptr.vmem [resolvable:$true] %s423_s30 }
  0x22   : > { %2043 = dma.hbm_to_vmem [thread:$0]  (!%p2727_p5), %s422_s9, 512, %s424_s30, [#allocation20], %s2610_s23, %s2610_s23, %s2611_s26  }
  0x23   : > { %s379_s29 = sshll.u32 %s3276_s4, 4  ;;  %s2613_s1 = smov [#allocation12]   ;;  %s380_s29 = int_to_ptr.hbm [resolvable:$true] %s379_s29 }
  0x24   : > { %s353_s28 = sshll.u32 %s2613_s1, 4  ;;  %s2614_s19 = smov [#allocation15]   ;;  %s354_s28 = int_to_ptr.vmem [resolvable:$true] %s353_s28 }
  0x25   : > { %s381_s21 = sshll.u32 %s2614_s19, 4  ;;  %s407_s30 = sshll.u32 %s3278_s6, 4  ;;  %s382_s21 = int_to_ptr.vmem [resolvable:$true] %s381_s21  ;;  %s408_s30 = int_to_ptr.hbm [resolvable:$true] %s407_s30 }
  0x26   : > { %2034 = dma.hbm_to_vmem [thread:$0]  (!%p2727_p5), %s380_s29, 512, %s382_s21, [#allocation14], %s2610_s23, %s2610_s23, %s2611_s26  }
  0x27   : > { %s351_s25 = sshll.u32 %s3296_s2, 4  ;;  %s2615_s3 = smov [#allocation18]   ;;  %s352_s25 = int_to_ptr.hbm [resolvable:$true] %s351_s25 }
  0x28   : > { %2028 = dma.hbm_to_vmem [thread:$0]  (!%p2727_p5), %s352_s25, 1024, %s354_s28, [#allocation11], %s2606_s11, %s2606_s11, %s2607_s12  }
  0x29   : > { %s436_s25 = sshll.u32 %s3280_s8, 4  ;;  %s409_s10 = sshll.u32 %s2615_s3, 4  ;;  %s437_s25 = int_to_ptr.hbm [resolvable:$true] %s436_s25  ;;  %s410_s10 = int_to_ptr.vmem [resolvable:$true] %s409_s10 }
  0x2a   : > { %2040 = dma.hbm_to_vmem [thread:$0]  (!%p2727_p5), %s408_s30, 512, %s410_s10, [#allocation17], %s2610_s23, %s2610_s23, %s2611_s26  }
  0x2b   : > { %s2616_s29 = smov [#allocation21]   ;;  %s43_s28 = sadd.s32 1, %s2599_s17 }
  0x2c   : > { %s438_s1 = sshll.u32 %s2616_s29, 4  ;;  %s1868_s19 = sadd.s32 4294967294, %s2603_s18   ;;  %s439_s1 = int_to_ptr.vmem [resolvable:$true] %s438_s1 }
  0x2d   : > { %2046 = dma.hbm_to_vmem [thread:$0]  (!%p2727_p5), %s437_s25, 128, %s439_s1, [#allocation20]  }
  0x2e   : > { %p44_p6 = scmp.ge.s32.totalorder %s43_s28, 8  ;;  %s55_s21 = sadd.s32 1, %s2591_s15 }
  0x2f   : > { %p62_p7 = scmp.ne.s32.totalorder %s2591_s15, %s2587_s14  ;;  %p63_p8 = scmp.eq.s32.totalorder %s2603_s18, 0 }
  0x30   : > { %s3311_s28 = smov (%p44_p6, %s43_s28), 0  ;;  %p68_p9 = scmp.ne.s32.totalorder %s2587_s14, %s2583_s13 }
  0x31   : > { %s50_s23 = ssub.s32 %s2599_s17, %s3311_s28  ;;  %s3297_s26 = sadd.s32 4294967295, %s2603_s18  }
  0x32   : > { %p277_p10 = scmp.eq.s32.totalorder %s3297_s26, 7  ;;  %p53_p11 = scmp.eq.s32.totalorder %s50_s23, 0 }
  0x33   : > { %p2802_p12 = por %p2711_p1, %p68_p9  ;;  %p283_p0 = scmp.eq.s32.totalorder %s1868_s19, 7 }
  0x34   : > { %p2806_p13 = por %p277_p10, %p62_p7  ;;  %p64_p2 = por %p63_p8, %p62_p7 }
  0x35   : > { %s2811_s9 = scalar_select %p53_p11, %s2591_s15, %s55_s21  }
  0x36   : > { %p2813_p4 = por %p283_p0, %p68_p9  ;;  %s449_s11 = sand.u32 1, %s2591_s15  }
  0x37   : > { %s1880_s12 = sshll.u32 %s2599_s17, 2  ;;  %p2066_p5 = scmp.lt.s32.totalorder %s2603_s18, 8 }
  0x38   : > { %s1879_s25 = sshll.u32 %s449_s11, 2  ;;  %s458_s29 = scalar_lea.hbm %s3272_s0, %s1880_s12 }
  0x39   : > { %s460_s1 = sshll.u32 %s458_s29, 4  ;;  %s453_s23 = scalar_lea.vmem [#allocation7], %s1879_s25  ;;  %s461_s1 = int_to_ptr.hbm [resolvable:$true] %s460_s1 }
  0x3a   : > { %s462_s26 = sshll.u32 %s453_s23, 4  ;;  %p2048_p6 = pnand %p2066_p5, %p64_p2  ;;  %s463_s26 = int_to_ptr.vmem [resolvable:$true] %s462_s26 }
  0x3b   : > { %s450_s19 = scalar_lea.sflag [#allocation8], %s449_s11  ;;  %471 = sbr.rel (%p2719_p3) target bundleno = 2186 (0x88a), region = 56 }
  0x3c   : > { %2050 = dma.hbm_to_vmem [thread:$0]  (!%p2048_p6), %s461_s1, 64, %s463_s26, %s450_s19  }
  0x3d   : > { %s2826_s21 = sand.u32 (!%p2719_p3), 1, %s2587_s14  }
  0x3e   : > { %s2829_s2 = sshll.u32 (!%p2719_p3), %s2826_s21, 2  ;;  %s474_s12 = scalar_lea.sflag (!%p2719_p3), [#allocation8], %s2826_s21 }
  0x3f   : > { %s477_s25 = scalar_lea.vmem (!%p2719_p3), [#allocation7], %s2829_s2 }
  0x40   : > { %2554 = dma.done.wait (%p2802_p12), %s474_s12, 64  }
  0x41   : > { %2556 = vsyncadd (%p2802_p12), %s474_s12, 4294967232 }
  0x42   : > { %2558 = dma.done.wait (%p2711_p1), [#allocation11], 2048  }
  0x43   : > { %2560 = vsyncadd (%p2711_p1), [#allocation11], 4294965248 }
  0x44   : > { %2562 = dma.done.wait (%p2711_p1), [#allocation14], 640  }
  0x45   : > { %2564 = vsyncadd (%p2711_p1), [#allocation14], 4294966656 }
  0x46   : > { %2566 = dma.done.wait (%p2711_p1), [#allocation17], 1024  }
  0x47   : > { %2568 = vsyncadd (%p2711_p1), [#allocation17], 4294966272 }
  0x48   : > { %2570 = dma.done.wait (%p2711_p1), [#allocation20], 640  }
  0x49   : > { %2572 = vsyncadd (%p2711_p1), [#allocation20], 4294966656  ;;  %s552_s24 = scalar_lea.vmem [#allocation22], %s2829_s2  ;;  %p1893_p3 = scmp.ne.s32.totalorder %s2595_s16, 0 }
  0x4b   : > { %565 = sbr.rel (%p1893_p3) target bundleno = 86 (0x56), region = 96 }
  0x50   : > { %vm566_vm0 = vcmask 261120   ;;  %v2617_v0 = vmov 0.0  }
  0x51   : > { %567 = vst.msk [vmem:[#allocation2] sm:$0xff] %vm566_vm0, %v2617_v0 }
  0x52   : > { %568 = vst.msk [vmem:[#allocation3] sm:$0xff] %vm566_vm0, %v2617_v0 }
  0x53   : > { %569 = vst.msk [vmem:[#allocation4] sm:$0xff] %vm566_vm0, %v2617_v0 }
  0x54   : > { %570 = vst.msk [vmem:[#allocation5] sm:$0xff] %vm566_vm0, %v2617_v0 }
  0x55   : > { %571 = vst.msk [vmem:[#allocation6] sm:$0xff] %vm566_vm0, %v2617_v0 }
  0x56 PF: > { %v579_v1 = vld [vmem:[#allocation15 + $0x18] sm:$0xff]  ;;  %v578_v2 = vld [vmem:[#allocation15 + $0x10] sm:$0xff]  ;;  %v577_v5 = vld [vmem:[#allocation15 + $0x8] sm:$0xff]  ;;  %vm580_vm1 = vcmask 261120   ;;  %s2618_s20 = smov 32   ;;  %s2619_s11 = smov 64   ;;  %v932_v57 = vlaneseq }
  0x57   : > { %v608_v3 = vld [vmem:[#allocation16 + $0x18] sm:$0xff]  ;;  %596 = vmatpush.msra.mxu0 %v579_v1  ;;  %v607_v4 = vld [vmem:[#allocation16 + $0x10] sm:$0xff]  ;;  %v606_v6 = vld [vmem:[#allocation16 + $0x8] sm:$0xff]  ;;  %s2620_s3 = smov 96   ;;  %vm1136_vm10 = vcmask 130112   ;;  %vm1159_vm11 = vcmask 1041409  }
  0x58   : > { %624 = vmatpush.msra.mxu1 %v608_v3  ;;  %v576_v7 = vld [vmem:[#allocation15] sm:$0xff]  ;;  %v573_v10 = vld [vmem:[#allocation2] sm:$0xff]  ;;  %v574_v11 = vld [vmem:[%s477_s25] sm:$0xf]  ;;  %v933_v59 = vshrl.u32 %v932_v57, 7  ;;  %vm1161_vm12 = vcmask 1042434  }
  0x59   : > { %597 = vmatpush.msra.mxu0 %v578_v2  ;;  %v605_v8 = vld [vmem:[#allocation16] sm:$0xff]  ;;  %v575_v12 = vunpack.c.l.bf16 %v574_v11  ;;  %v633_v18 = vld [vmem:[#allocation3] sm:$0xff]  ;;  %v690_v39 = vld [vmem:[#allocation18 + $0x18] sm:$0xff]  ;;  %vm1163_vm13 = vcmask 1043459   ;;  %vm1165_vm14 = vcmask 1044484   ;;  %vm1167_vm15 = vcmask 1045509  }
  0x5a   : > { %625 = vmatpush.msra.mxu1 %v607_v4  ;;  %v689_v40 = vld [vmem:[#allocation18 + $0x10] sm:$0xff]  ;;  %v717_v41 = vld [vmem:[#allocation19 + $0x18] sm:$0xff]  ;;  %705 = vmatpush.msra.mxu2 %v690_v39  ;;  %v688_v43 = vld [vmem:[#allocation18 + $0x8] sm:$0xff]  ;;  %v940_v63 = vadd.s32 8, %v933_v59  ;;  %vm1169_vm0 = vcmask 1046534   ;;  %s1902_s10 = sshll.u32 %s2595_s16, 2 }
  0x5b   : > { %598 = vmatpush.msra.mxu0 %v577_v5  ;;  %733 = vmatpush.msra.mxu3 %v717_v41  ;;  %v716_v42 = vld [vmem:[#allocation19 + $0x10] sm:$0xff]  ;;  %v715_v44 = vld [vmem:[#allocation19 + $0x8] sm:$0xff]  ;;  %v687_v45 = vld [vmem:[#allocation18] sm:$0xff]  ;;  %s3301_s23 = sld [smem:[#allocation35_spill]]  ;;  %s3197_s19 = sshll.u32 %s552_s24, 4  ;;  %s1654_s19 = int_to_ptr.vmem [resolvable:$true] %s3197_s19 }
  0x5c   : > { %626 = vmatpush.msra.mxu1 %v606_v6  ;;  %v572_v9 = vld [vmem:[#allocation6] sm:$0xff]  ;;  %706 = vmatpush.msra.mxu2 %v689_v40  ;;  %v714_v48 = vld [vmem:[#allocation19] sm:$0xff]  ;;  %v685_v49 = vld [vmem:[#allocation4] sm:$0xff]  ;;  %s1635_s25 = scalar_lea.sflag [#allocation9], %s2826_s21 }
  0x5d   : > { %599 = vmatpush.msra.mxu0 %v576_v7  ;;  %734 = vmatpush.msra.mxu3 %v716_v42  ;;  %v742_v50 = vld [vmem:[#allocation5] sm:$0xff]  ;;  %v929_v60 = vld [vmem:[#allocation13] sm:$0xff] }
  0x5e   : > { %627 = vmatpush.msra.mxu1 %v605_v8  ;;  %1894 = vmatmul.msk.f32.vlgmr.msra.gmra.mxu0 %vm580_vm1, %v572_v9  ;;  %v686_v53 = vld [vmem:[#allocation21] sm:$0xff]  ;;  %v931_v61 = vperm.slane %v929_v60, 0  ;;  %v944_v0 = vperm.slane %v929_v60, 1  ;;  %v957_v1 = vperm.slane %v929_v60, 2  ;;  %v970_v2 = vperm.slane %v929_v60, 3 }
  0x5f   : > { %1895 = vmatmul.msk.f32.vlgmr.msra.gmra.mxu1 %vm580_vm1, %v573_v10  ;;  %707 = vmatpush.msra.mxu2 %v688_v43  ;;  %v996_v3 = vperm.slane %v929_v60, 5  ;;  %v983_v8 = vperm.slane %v929_v60, 4 }
  0x60   : > { %735 = vmatpush.msra.mxu3 %v715_v44  ;;  %2141 = vset.pattern.permute.xlu2 %v933_v59 }
  0x61   : > { %708 = vmatpush.msra.mxu2 %v687_v45  ;;  %2144 = vset.pattern.permute.xlu0 %v933_v59  ;;  %s1651_s26 = scalar_lea.hbm %s3301_s23, %s1902_s10  ;;  %s2493_s1 = scalar_lea.hbm %s3301_s23, 32 }
  0x62   : > { %736 = vmatpush.msra.mxu3 %v714_v48  ;;  %2142 = vset.pattern.permute.xlu1 %v933_v59  ;;  %s1655_s12 = sshll.u32 %s1651_s26, 4  ;;  %s1656_s12 = int_to_ptr.hbm [resolvable:$true] %s1655_s12 }
  0x63   : > { %1898 = vmatmul.msk.f32.vlgmr.msra.gmra.mxu3 %vm580_vm1, %v685_v49 }
  0xdb   : > { %v601_v13 = vpop.f32.mrf.mxu0 }
  0xdc   : > { %v629_v14 = vpop.f32.mrf.mxu1  ;;  %v604_v15 = vadd.f32 %v601_v13, %v575_v12 }
  0xde   : > { %v632_v16 = vadd.f32 %v629_v14, %v604_v15 }
  0xe0   : > { %2153 = vtanh.f32 %v632_v16  ;;  %v1896_v19 = vmul.f32 -1.442695, %v632_v16 }
  0xe2   : > { %2155 = vpow2.f32 %v1896_v19 }
  0xe6   : > { %v2154_v17 = vpop.eup %2153  ;;  %v738_v55 = vpop.f32.mrf.mxu3 }
  0xe7   : > { %660 = vrot.lane.b32.xlu0 %v2154_v17, %s2618_s20 }
  0xe8   : > { %v2156_v20 = vpop.eup %2155 }
  0xe9   : > { %v637_v21 = vadd.f32 1.0, %v2156_v20  ;;  %v1009_v20 = vperm.slane %v929_v60, 6 }
  0xeb   : > { %2157 = vrcp.f32 %v637_v21  ;;  %v649_v27 = vand.u32 2147483648, %v637_v21  ;;  %vm643_vm3 = vweird.f32 %v637_v21  ;;  %v647_v28 = vand.u32 2147483647, %v637_v21 }
  0xed   : > { %v650_v30 = vor.u32 1.1754944e-38, %v649_v27  ;;  %vm648_vm5 = vcmp.eq.f32.partialorder %v647_v28, 8.507059e+37 }
  0xef   : > { %655 = vrot.lane.b32.xlu0 %v633_v18, %s2618_s20 }
  0xf1   : > { %v2158_v22 = vpop.eup %2157 }
  0xf2   : > { %v639_v23 = vmul.f32 %v2158_v22, %v637_v21  ;;  %vm644_vm2 = vweird.f32 %v2158_v22  ;;  %v1022_v21 = vperm.slane %v929_v60, 7 }
  0xf3   : > { %vm645_vm4 = vmor %vm643_vm3, %vm644_vm2  ;;  %vm1171_vm2 = vcmask 1047559   ;;  %vm1174_vm3 = vcmask 130048  }
  0xf4   : > { %v640_v24 = vsub.f32 1.0, %v639_v23 }
  0xf6   : > { %v641_v25 = vmul.f32 %v2158_v22, %v640_v24 }
  0xf7   : > { %764 = vrot.lane.b32.xlu0 %v742_v50, %s2618_s20 }
  0xf8   : > { %v642_v26 = vadd.f32 %v2158_v22, %v641_v25 }
  0xfa   : > { %v646_v29 = vsel %vm645_vm4, %v2158_v22, %v642_v26  ;;  %vm1598_vm4 = vcmask 257024  }
  0xfb   : > { %v651_v32 = vsel %vm648_vm5, %v650_v30, %v646_v29 }
  0xff   : > { %988 = vperm.xlu0 %2144, %v983_v8  }
 0x107   : > { %2145 = vset.pattern.permute.xlu0 %v940_v63 }
 0x10f   : > { %942 = vperm.xlu0 %2145, %v931_v61  }
 0x117   : > { %1020 = vperm.xlu0 %2145, %v1009_v20  }
 0x159   : > { %v661_v31 = vpop.permute.xlu0 %660 }
 0x15a   : > { %v663_v33 = vmul.f32 %v661_v31, %v651_v32 }
 0x15c   : > { %665 = vrot.lane.b32.xlu1 %v663_v33, %s2618_s20 }
 0x161   : > { %v656_v34 = vpop.permute.xlu0 %655 }
 0x162   : > { %v658_v35 = vmul.f32 %v656_v34, %v651_v32 }
 0x169   : > { %v765_v27 = vpop.permute.xlu0 %764 }
 0x1ce   : > { %v666_v36 = vpop.permute.xlu1 %665 }
 0x1cf   : > { %v668_v37 = vadd.f32 %v666_v36, %v658_v35  ;;  %v2891_v35 = vpop.permute.xlu0 %988 }
 0x1d1   : > { %2159 = vtanh.f32 %v668_v37 }
 0x1d7   : > { %v2160_v38 = vpop.eup %2159  ;;  %v2893_v36 = vpop.permute.xlu0 %942 }
 0x1d8   : > { %671 = vrot.lane.b32.xlu1 %v2160_v38, %s2618_s20 }
 0x24a   : > { %v672_v46 = vpop.permute.xlu1 %671 }
 0x24b   : > { %v674_v47 = vmul.f32 %v672_v46, %v651_v32 }
 0x24d   : > { %676 = vrot.lane.b32.xlu2 %v674_v47, %s2619_s11 }
 0x255   : > { %681 = vrot.lane.b32.xlu2 %v668_v37, %s2620_s3  ;;  %v2895_v37 = vpop.permute.xlu0 %1020 }
 0x25d   : > { %936 = vperm.xlu2 %2141, %v931_v61  }
 0x265   : > { %2143 = vset.pattern.permute.xlu2 %v940_v63 }
 0x26d   : > { %955 = vperm.xlu2 %2143, %v944_v0  }
 0x275   : > { %968 = vperm.xlu2 %2143, %v957_v1  }
 0x27d   : > { %981 = vperm.xlu2 %2143, %v970_v2  }
 0x285   : > { %2147 = vset.pattern.permute.xlu2 %v933_v59 }
 0x28d   : > { %1001 = vperm.xlu2 %2147, %v996_v3  }
 0x2a7   : > { %v677_v51 = vpop.permute.xlu2 %676 }
 0x2a8   : > { %679 = vst.msk [vmem:[#allocation2] sm:$0xff] %vm580_vm1, %v677_v51  ;;  %1897 = vmatmul.msk.f32.vlgmr.msra.gmra.mxu2 %vm580_vm1, %v677_v51 }
 0x2af   : > { %v682_v52 = vpop.permute.xlu2 %681 }
 0x2b0   : > { %684 = vst.msk [vmem:[#allocation3] sm:$0xff] %vm580_vm1, %v682_v52 }
 0x2b7   : > { %v2874_v22 = vpop.permute.xlu2 %936 }
 0x2c7   : > { %v2876_v23 = vpop.permute.xlu2 %955 }
 0x2cf   : > { %v2878_v24 = vpop.permute.xlu2 %968 }
 0x2d7   : > { %v2880_v25 = vpop.permute.xlu2 %981 }
 0x2e7   : > { %v2882_v26 = vpop.permute.xlu2 %1001 }
 0x32b   : > { %v710_v54 = vpop.f32.mrf.mxu2 }
 0x32c   : > { %v713_v56 = vadd.f32 %v710_v54, %v686_v53 }
 0x32e   : > { %v741_v58 = vadd.f32 %v738_v55, %v713_v56 }
 0x330   : > { %2161 = vtanh.f32 %v741_v58  ;;  %v1899_v4 = vmul.f32 -1.442695, %v741_v58 }
 0x332   : > { %2163 = vpow2.f32 %v1899_v4  ;;  %v1970_v4 = vld [vmem:[#allocation10 + $0x8] sm:$0xff]  }
 0x336   : > { %v2162_v62 = vpop.eup %2161 }
 0x337   : > { %769 = vrot.lane.b32.xlu1 %v2162_v62, %s2618_s20  ;;  %v1907_v62 = vld [vmem:[#allocation10] sm:$0xff]  }
 0x338   : > { %v2164_v5 = vpop.eup %2163 }
 0x339   : > { %v746_v6 = vadd.f32 1.0, %v2164_v5 }
 0x33b   : > { %2165 = vrcp.f32 %v746_v6  ;;  %v758_v13 = vand.u32 2147483648, %v746_v6  ;;  %vm752_vm7 = vweird.f32 %v746_v6  ;;  %v756_v14 = vand.u32 2147483647, %v746_v6 }
 0x33d   : > { %v759_v16 = vor.u32 1.1754944e-38, %v758_v13  ;;  %vm757_vm9 = vcmp.eq.f32.partialorder %v756_v14, 8.507059e+37  ;;  %v1972_v14 = vld [vmem:[#allocation10 + $0x18] sm:$0xff]  }
 0x33f   : > { %949 = vperm.xlu1 %2142, %v944_v0   ;;  %v1909_v0 = vunpack.c.h.bf16 %v1907_v62 }
 0x341   : > { %v2166_v7 = vpop.eup %2165 }
 0x342   : > { %v748_v9 = vmul.f32 %v2166_v7, %v746_v6  ;;  %vm753_vm6 = vweird.f32 %v2166_v7 }
 0x343   : > { %vm754_vm8 = vmor %vm752_vm7, %vm753_vm6 }
 0x344   : > { %v749_v10 = vsub.f32 1.0, %v748_v9 }
 0x346   : > { %v750_v11 = vmul.f32 %v2166_v7, %v749_v10  ;;  %v1912_v10 = vunpack.c.l.bf16 %v1970_v4 }
 0x347   : > { %962 = vperm.xlu1 %2142, %v957_v1  }
 0x348   : > { %v751_v12 = vadd.f32 %v2166_v7, %v750_v11  ;;  %v1913_v11 = vunpack.c.h.bf16 %v1970_v4 }
 0x34a   : > { %v755_v15 = vsel %vm754_vm8, %v2166_v7, %v751_v12 }
 0x34b   : > { %v760_v17 = vsel %vm757_vm9, %v759_v16, %v755_v15 }
 0x34c   : > { %v767_v28 = vmul.f32 %v765_v27, %v760_v17 }
 0x34f   : > { %975 = vperm.xlu1 %2142, %v970_v2   ;;  %v1971_v2 = vld [vmem:[#allocation10 + $0x10] sm:$0xff]  }
 0x350   : > { %v1917_v7 = vunpack.c.h.bf16 %v1971_v2  ;;  %v1916_v27 = vunpack.c.l.bf16 %v1971_v2 }
 0x357   : > { %2146 = vset.pattern.permute.xlu1 %v940_v63 }
 0x35f   : > { %994 = vperm.xlu1 %2146, %v983_v8  }
 0x367   : > { %1007 = vperm.xlu1 %2146, %v996_v3  }
 0x36f   : > { %2148 = vset.pattern.permute.xlu1 %v933_v59 }
 0x377   : > { %1027 = vperm.xlu1 %2148, %v1022_v21  }
 0x3a9   : > { %v770_v18 = vpop.permute.xlu1 %769 }
 0x3aa   : > { %v772_v19 = vmul.f32 %v770_v18, %v760_v17  ;;  %v1973_v18 = vld [vmem:[#allocation10 + $0x20] sm:$0xff]  }
 0x3ac   : > { %774 = vrot.lane.b32.xlu2 %v772_v19, %s2618_s20  ;;  %v1920_v19 = vunpack.c.l.bf16 %v1972_v14 }
 0x3b1   : > { %v2917_v55 = vpop.permute.xlu1 %949 }
 0x3b4   : > { %1014 = vperm.xlu2 %2147, %v1009_v20  }
 0x3b9   : > { %v2919_v56 = vpop.permute.xlu1 %962 }
 0x3bc   : > { %2149 = vset.pattern.permute.xlu2 %v940_v63  ;;  %v1908_v63 = vunpack.c.l.bf16 %v1907_v62 }
 0x3c1   : > { %v2921_v58 = vpop.permute.xlu1 %975 }
 0x3c4   : > { %1033 = vperm.xlu2 %2149, %v1022_v21  }
 0x3d1   : > { %v2923_v59 = vpop.permute.xlu1 %994 }
 0x3d9   : > { %v2925_v60 = vpop.permute.xlu1 %1007 }
 0x3e9   : > { %v2927_v61 = vpop.permute.xlu1 %1027 }
 0x406   : > { %v775_v29 = vpop.permute.xlu2 %774 }
 0x407   : > { %v777_v30 = vadd.f32 %v775_v29, %v767_v28 }
 0x409   : > { %2167 = vtanh.f32 %v777_v30  ;;  %790 = vrot.lane.b32.xlu2 %v777_v30, %s2620_s3  ;;  %v1924_v30 = vunpack.c.l.bf16 %v1973_v18 }
 0x40e   : > { %v2886_v32 = vpop.permute.xlu2 %1014 }
 0x40f   : > { %v2168_v31 = vpop.eup %2167 }
 0x410   : > { %780 = vrot.lane.b32.xlu0 %v2168_v31, %s2618_s20  ;;  %s2487_s20 = sshra.s32 %s1656_s12, 4  ;;  %s2488_s20 = int_to_ptr.hbm [resolvable:$true] %s2487_s20 }
 0x411   : > { %p2494_p9 = scmp.lt.s32.totalorder %s2488_s20, %s3301_s23 }
 0x41e   : > { %v2888_v33 = vpop.permute.xlu2 %1033 }
 0x463   : > { %v791_v34 = vpop.permute.xlu2 %790 }
 0x464   : > { %793 = vst.msk [vmem:[#allocation5] sm:$0xff] %vm580_vm1, %v791_v34 }
 0x482   : > { %v781_v38 = vpop.permute.xlu0 %780 }
 0x483   : > { %v2897_v39 = vmul.f32 %v781_v38, %v760_v17 }
 0x485   : > { %785 = vrot.lane.b32.xlu1 %v2897_v39, %s2619_s11  ;;  %v833_v40 = vperm.slane %v2897_v39, 0  ;;  %v827_v41 = vrot.slane %v2897_v39, 2  ;;  %v826_v43 = vrot.slane %v2897_v39, 1  ;;  %v828_v44 = vrot.slane %v2897_v39, 3 }
 0x486   : > { %v830_v46 = vrot.slane %v2897_v39, 5  ;;  %v829_v49 = vrot.slane %v2897_v39, 4  ;;  %v831_v50 = vrot.slane %v2897_v39, 6  ;;  %v832_v53 = vrot.slane %v2897_v39, 7 }
 0x487   : > { %841 = vrot.lane.b32.xlu0 %v833_v40, %s2619_s11  ;;  %v835_v42 = vperm.slane %v827_v41, 0  ;;  %v834_v45 = vperm.slane %v826_v43, 0  ;;  %v836_v47 = vperm.slane %v828_v44, 0  ;;  %v1974_v41 = vld [vmem:[#allocation10 + $0x28] sm:$0xff]  }
 0x488   : > { %v838_v48 = vperm.slane %v830_v46, 0  ;;  %v837_v51 = vperm.slane %v829_v49, 0  ;;  %v839_v52 = vperm.slane %v831_v50, 0  ;;  %v840_v54 = vperm.slane %v832_v53, 0  ;;  %v1975_v50 = vld [vmem:[#allocation10 + $0x30] sm:$0xff]   ;;  %v1976_v53 = vld [vmem:[#allocation10 + $0x38] sm:$0xff]  }
 0x489   : > { %845 = vrot.lane.b32.xlu2 %v835_v42, %s2619_s11  ;;  %v1925_v42 = vunpack.c.h.bf16 %v1973_v18  ;;  %v1929_v44 = vunpack.c.h.bf16 %v1974_v41 }
 0x48d   : > { %843 = vrot.lane.b32.xlu1 %v834_v45, %s2619_s11  ;;  %v1921_v45 = vunpack.c.h.bf16 %v1972_v14 }
 0x48f   : > { %847 = vrot.lane.b32.xlu0 %v836_v47, %s2619_s11 }
 0x491   : > { %851 = vrot.lane.b32.xlu2 %v838_v48, %s2619_s11 }
 0x495   : > { %849 = vrot.lane.b32.xlu1 %v837_v51, %s2619_s11 }
 0x497   : > { %853 = vrot.lane.b32.xlu0 %v839_v52, %s2619_s11 }
 0x49d   : > { %855 = vrot.lane.b32.xlu1 %v840_v54, %s2619_s11  ;;  %v1932_v54 = vunpack.c.l.bf16 %v1975_v50 }
 0x4e3   : > { %v846_v12 = vpop.permute.xlu2 %845 }
 0x4e4   : > { %v870_v15 = vmul.f32 %v1917_v7, %v846_v12  ;;  %v869_v38 = vmul.f32 %v1916_v27, %v846_v12 }
 0x4e6   : > { %v896_v29 = vsel %vm580_vm1, %v870_v15, 0.0  ;;  %v893_v47 = vsel %vm580_vm1, %v869_v38, 0.0 }
 0x4eb   : > { %v852_v48 = vpop.permute.xlu2 %851 }
 0x4ec   : > { %v876_v51 = vmul.f32 %v1929_v44, %v852_v48 }
 0x4f7   : > { %v786_v1 = vpop.permute.xlu1 %785 }
 0x4f8   : > { %788 = vst.msk [vmem:[#allocation4] sm:$0xff] %vm580_vm1, %v786_v1  ;;  %v1936_v1 = vunpack.c.l.bf16 %v1976_v53 }
 0x4f9   : > { %v842_v3 = vpop.permute.xlu0 %841 }
 0x4fa   : > { %v865_v5 = vmul.f32 %v1908_v63, %v842_v3  ;;  %v866_v6 = vmul.f32 %v1909_v0, %v842_v3  ;;  %v1928_v0 = vunpack.c.l.bf16 %v1974_v41  ;;  %v914_v3 = vsel %vm580_vm1, %v876_v51, 0.0 }
 0x4fc   : > { %v884_v8 = vsel %vm580_vm1, %v866_v6, 0.0  ;;  %v881_v9 = vsel %vm580_vm1, %v865_v5, 0.0  ;;  %v875_v6 = vmul.f32 %v1928_v0, %v852_v48 }
 0x4fd   : > { %885 = vadd.xlane.f32.xlu0 %v884_v8  ;;  %882 = vadd.xlane.f32.xlu2 %v881_v9  ;;  %v1937_v8 = vunpack.c.h.bf16 %v1976_v53 }
 0x4fe   : > { %v911_v12 = vsel %vm580_vm1, %v875_v6, 0.0 }
 0x4ff   : > { %v844_v13 = vpop.permute.xlu1 %843 }
 0x500   : > { %v867_v16 = vmul.f32 %v1912_v10, %v844_v13  ;;  %v868_v17 = vmul.f32 %v1913_v11, %v844_v13  ;;  %v1933_v10 = vunpack.c.h.bf16 %v1975_v50 }
 0x501   : > { %v848_v21 = vpop.permute.xlu0 %847 }
 0x502   : > { %v887_v20 = vsel %vm580_vm1, %v867_v16, 0.0  ;;  %v890_v28 = vsel %vm580_vm1, %v868_v17, 0.0  ;;  %v871_v31 = vmul.f32 %v1920_v19, %v848_v21  ;;  %v872_v52 = vmul.f32 %v1921_v45, %v848_v21 }
 0x503   : > { %888 = vadd.xlane.f32.xlu1 %v887_v20  ;;  %v2621_v17 = vmov 0  }
 0x504   : > { %v899_v43 = vsel %vm580_vm1, %v871_v31, 0.0  ;;  %v902_v2 = vsel %vm580_vm1, %v872_v52, 0.0  ;;  %2150 = vset.pattern.permute.xlu1 %v2621_v17  ;;  %2151 = vset.pattern.permute.xlu2 %v2621_v17 }
 0x505   : > { %891 = vadd.xlane.f32.xlu2 %v890_v28  ;;  %897 = vadd.xlane.f32.xlu0 %v896_v29 }
 0x506   : > { %2152 = vset.pattern.permute.xlu0 %v2621_v17 }
 0x507   : > { %v850_v34 = vpop.permute.xlu1 %849 }
 0x508   : > { %v873_v40 = vmul.f32 %v1924_v30, %v850_v34  ;;  %v874_v49 = vmul.f32 %v1925_v42, %v850_v34 }
 0x509   : > { %v854_v63 = vpop.permute.xlu0 %853 }
 0x50a   : > { %v905_v46 = vsel %vm580_vm1, %v873_v40, 0.0  ;;  %v908_v62 = vsel %vm580_vm1, %v874_v49, 0.0  ;;  %v877_v5 = vmul.f32 %v1932_v54, %v854_v63  ;;  %v878_v14 = vmul.f32 %v1933_v10, %v854_v63 }
 0x50b   : > { %900 = vadd.xlane.f32.xlu1 %v899_v43 }
 0x50c   : > { %v917_v9 = vsel %vm580_vm1, %v877_v5, 0.0  ;;  %v920_v16 = vsel %vm580_vm1, %v878_v14, 0.0 }
 0x50d   : > { %906 = vadd.xlane.f32.xlu0 %v905_v46  ;;  %894 = vadd.xlane.f32.xlu2 %v893_v47 }
 0x50f   : > { %v856_v4 = vpop.permute.xlu1 %855 }
 0x510   : > { %v879_v7 = vmul.f32 %v1936_v1, %v856_v4  ;;  %v880_v13 = vmul.f32 %v1937_v8, %v856_v4 }
 0x512   : > { %v923_v11 = vsel %vm580_vm1, %v879_v7, 0.0  ;;  %v926_v15 = vsel %vm580_vm1, %v880_v13, 0.0 }
 0x513   : > { %909 = vadd.xlane.f32.xlu1 %v908_v62  ;;  %v3011_v62 = vand.u32 127, %v932_v57 }
 0x515   : > { %903 = vadd.xlane.f32.xlu2 %v902_v2  ;;  %915 = vadd.xlane.f32.xlu0 %v914_v3  ;;  %v3014_v1 = vadd.s32 4294967288, %v3011_v62 }
 0x51b   : > { %918 = vadd.xlane.f32.xlu1 %v917_v9 }
 0x51d   : > { %924 = vadd.xlane.f32.xlu0 %v923_v11  ;;  %912 = vadd.xlane.f32.xlu2 %v911_v12 }
 0x523   : > { %927 = vadd.xlane.f32.xlu1 %v926_v15 }
 0x525   : > { %921 = vadd.xlane.f32.xlu2 %v920_v16 }
 0x570   : > { %v886_v18 = vpop.xlane.xlu0 %885  ;;  %v883_v19 = vpop.xlane.xlu2 %882 }
 0x571   : > { %v2947_v20 = vadd.f32 %v2893_v36, %v886_v18  ;;  %v2950_v21 = vadd.f32 %v2874_v22, %v883_v19 }
 0x573   : > { %1087 = vperm.xlu2 %2151, %v2947_v20   ;;  %1084 = vperm.xlu1 %2150, %v2950_v21  }
 0x576   : > { %v889_v27 = vpop.xlane.xlu1 %888 }
 0x577   : > { %v2955_v28 = vadd.f32 %v2917_v55, %v889_v27 }
 0x578   : > { %v898_v29 = vpop.xlane.xlu0 %897  ;;  %v892_v30 = vpop.xlane.xlu2 %891 }
 0x579   : > { %v2958_v31 = vadd.f32 %v2876_v23, %v892_v30  ;;  %1090 = vperm.xlu0 %2152, %v2955_v28   ;;  %v2963_v34 = vadd.f32 %v2878_v24, %v898_v29 }
 0x57b   : > { %1093 = vperm.xlu1 %2150, %v2958_v31  }
 0x57e   : > { %v901_v36 = vpop.xlane.xlu1 %900 }
 0x57f   : > { %v2971_v23 = vadd.f32 %v2921_v58, %v901_v36 }
 0x580   : > { %v895_v22 = vpop.xlane.xlu2 %894  ;;  %v907_v40 = vpop.xlane.xlu0 %906 }
 0x581   : > { %v2966_v38 = vadd.f32 %v2919_v56, %v895_v22  ;;  %v2974_v41 = vadd.f32 %v2891_v35, %v907_v40 }
 0x583   : > { %1099 = vperm.xlu1 %2150, %v2963_v34   ;;  %1096 = vperm.xlu2 %2151, %v2966_v38  }
 0x586   : > { %v910_v24 = vpop.xlane.xlu1 %909 }
 0x587   : > { %v2983_v44 = vadd.f32 %v2923_v59, %v910_v24 }
 0x588   : > { %v904_v55 = vpop.xlane.xlu2 %903  ;;  %v916_v56 = vpop.xlane.xlu0 %915 }
 0x589   : > { %v2977_v42 = vadd.f32 %v2880_v25, %v904_v55  ;;  %v2986_v58 = vadd.f32 %v2925_v60, %v916_v56 }
 0x58b   : > { %1108 = vperm.xlu1 %2150, %v2974_v41   ;;  %1102 = vperm.xlu2 %2151, %v2971_v23  }
 0x58c   : > { %1105 = vperm.xlu0 %2152, %v2977_v42  }
 0x58e   : > { %v919_v25 = vpop.xlane.xlu1 %918 }
 0x58f   : > { %v2995_v47 = vadd.f32 %v2886_v32, %v919_v25 }
 0x590   : > { %v913_v43 = vpop.xlane.xlu2 %912  ;;  %v925_v45 = vpop.xlane.xlu0 %924 }
 0x591   : > { %v2989_v35 = vadd.f32 %v2882_v26, %v913_v43  ;;  %v2998_v59 = vadd.f32 %v2927_v61, %v925_v45 }
 0x593   : > { %1117 = vperm.xlu1 %2150, %v2986_v58   ;;  %1111 = vperm.xlu2 %2151, %v2983_v44  }
 0x594   : > { %1114 = vperm.xlu0 %2152, %v2989_v35  }
 0x596   : > { %v928_v26 = vpop.xlane.xlu1 %927 }
 0x597   : > { %v3007_v48 = vadd.f32 %v2888_v33, %v928_v26 }
 0x598   : > { %v922_v46 = vpop.xlane.xlu2 %921 }
 0x599   : > { %v3001_v60 = vadd.f32 %v2895_v37, %v922_v46 }
 0x59b   : > { %1126 = vperm.xlu1 %2150, %v2998_v59   ;;  %1120 = vperm.xlu2 %2151, %v2995_v47  }
 0x59c   : > { %1123 = vperm.xlu0 %2152, %v3001_v60  }
 0x5a3   : > { %1129 = vperm.xlu2 %2151, %v3007_v48  }
 0x5cd   : > { %v1088_v32 = vpop.permute.xlu2 %1087 }
 0x5ce   : > { %v1135_v8 = vperm.slane %v1088_v32, %v3014_v1 }
 0x5dd   : > { %v1097_v49 = vpop.permute.xlu2 %1096 }
 0x5de   : > { %v1141_v57 = vperm.slane %v1097_v49, %v3011_v62 }
 0x5e5   : > { %v1085_v50 = vpop.permute.xlu1 %1084  ;;  %v1103_v61 = vpop.permute.xlu2 %1102 }
 0x5e6   : > { %v1133_v4 = vperm.slane %v1085_v50, %v3011_v62  ;;  %v1144_v9 = vperm.slane %v1103_v61, %v3011_v62 }
 0x5e8   : > { %v1137_v13 = vsel %vm1136_vm10, %v1135_v8, %v1133_v4 }
 0x5eb   : > { %v1091_v37 = vpop.permute.xlu0 %1090 }
 0x5ec   : > { %v1138_v5 = vperm.slane %v1091_v37, %v3011_v62 }
 0x5ed   : > { %v1094_v51 = vpop.permute.xlu1 %1093  ;;  %v1112_v53 = vpop.permute.xlu2 %1111 }
 0x5ee   : > { %v1139_v33 = vperm.slane %v1094_v51, %v3014_v1  ;;  %v1148_v18 = vperm.slane %v1112_v53, %v3014_v1 }
 0x5f0   : > { %v1140_v10 = vsel %vm1136_vm10, %v1139_v33, %v1138_v5 }
 0x5f1   : > { %v1160_v17 = vsel %vm1159_vm11, %v1140_v10, %v1137_v13 }
 0x5f5   : > { %v1100_v52 = vpop.permute.xlu1 %1099  ;;  %v1121_v0 = vpop.permute.xlu2 %1120 }
 0x5f6   : > { %v1142_v2 = vperm.slane %v1100_v52, %v3014_v1  ;;  %v1153_v56 = vperm.slane %v1121_v0, %v3011_v62 }
 0x5f8   : > { %v1143_v11 = vsel %vm1136_vm10, %v1142_v2, %v1141_v57 }
 0x5f9   : > { %v1162_v27 = vsel %vm1161_vm12, %v1143_v11, %v1160_v17 }
 0x5fd   : > { %v1109_v54 = vpop.permute.xlu1 %1108  ;;  %v1130_v19 = vpop.permute.xlu2 %1129 }
 0x5fe   : > { %v1106_v63 = vpop.permute.xlu0 %1105  ;;  %v1147_v12 = vperm.slane %v1109_v54, %v3011_v62  ;;  %v1157_v22 = vperm.slane %v1130_v19, %v3014_v1 }
 0x5ff   : > { %v1145_v6 = vperm.slane %v1106_v63, %v3014_v1 }
 0x600   : > { %v1149_v29 = vsel %vm1136_vm10, %v1148_v18, %v1147_v12 }
 0x601   : > { %v1146_v14 = vsel %vm1136_vm10, %v1145_v6, %v1144_v9 }
 0x602   : > { %v1164_v30 = vsel %vm1163_vm13, %v1146_v14, %v1162_v27 }
 0x603   : > { %v1166_v45 = vsel %vm1165_vm14, %v1149_v29, %v1164_v30 }
 0x605   : > { %v1118_v3 = vpop.permute.xlu1 %1117 }
 0x606   : > { %v1115_v7 = vpop.permute.xlu0 %1114  ;;  %v1151_v15 = vperm.slane %v1118_v3, %v3014_v1 }
 0x607   : > { %v1150_v16 = vperm.slane %v1115_v7, %v3011_v62 }
 0x609   : > { %v1152_v40 = vsel %vm1136_vm10, %v1151_v15, %v1150_v16 }
 0x60a   : > { %v1168_v26 = vsel %vm1167_vm15, %v1152_v40, %v1166_v45 }
 0x60d   : > { %v1127_v36 = vpop.permute.xlu1 %1126 }
 0x60e   : > { %v1156_v55 = vperm.slane %v1127_v36, %v3011_v62  ;;  %v1124_v24 = vpop.permute.xlu0 %1123 }
 0x60f   : > { %v1154_v43 = vperm.slane %v1124_v24, %v3014_v1 }
 0x610   : > { %v1158_v25 = vsel %vm1136_vm10, %v1157_v22, %v1156_v55 }
 0x611   : > { %v1155_v46 = vsel %vm1136_vm10, %v1154_v43, %v1153_v56 }
 0x612   : > { %v1170_v32 = vsel %vm1169_vm0, %v1155_v46, %v1168_v26 }
 0x613   : > { %v1172_v49 = vsel %vm1171_vm2, %v1158_v25, %v1170_v32 }
 0x614   : > { %v1175_v50 = vsel %vm1174_vm3, %v1172_v49, -inf }
 0x615   : > { %1176 = vmax.xlane.f32.xlu0 %v1175_v50 }
 0x688   : > { %v3048_v61 = vpop.xlane.xlu0 %1176 }
 0x689   : > { %v1184_v51 = vperm.slane %v3048_v61, 5  ;;  %v1179_v52 = vperm.slane %v3048_v61, 0  ;;  %v1180_v63 = vperm.slane %v3048_v61, 1  ;;  %v1181_v6 = vperm.slane %v3048_v61, 2 }
 0x68a   : > { %v1182_v8 = vperm.slane %v3048_v61, 3 }
 0x68b   : > { %v1206_v37 = vsub.f32 %v2986_v58, %v1184_v51  ;;  %v1196_v53 = vsub.f32 %v2947_v20, %v1179_v52  ;;  %v1195_v54 = vsub.f32 %v2950_v21, %v1179_v52  ;;  %v1198_v3 = vsub.f32 %v2958_v31, %v1180_v63 }
 0x68c   : > { %v1197_v4 = vsub.f32 %v2955_v28, %v1180_v63  ;;  %v1200_v31 = vsub.f32 %v2963_v34, %v1181_v6  ;;  %v1199_v28 = vsub.f32 %v2966_v38, %v1181_v6  ;;  %v1202_v12 = vsub.f32 %v2977_v42, %v1182_v8 }
 0x68d   : > { %v1233_v0 = vmul.f32 1.442695, %v1206_v37  ;;  %v1213_v33 = vmul.f32 1.442695, %v1196_v53  ;;  %v1211_v2 = vmul.f32 1.442695, %v1195_v54  ;;  %v1201_v34 = vsub.f32 %v2971_v23, %v1182_v8 }
 0x68e   : > { %v1217_v5 = vmul.f32 1.442695, %v1198_v3  ;;  %v1215_v20 = vmul.f32 1.442695, %v1197_v4  ;;  %v1221_v57 = vmul.f32 1.442695, %v1200_v31 }
 0x68f   : > { %2169 = vpow2.f32 %v1233_v0  ;;  %v1219_v9 = vmul.f32 1.442695, %v1199_v28  ;;  %v1225_v13 = vmul.f32 1.442695, %v1202_v12  ;;  %v1183_v38 = vperm.slane %v3048_v61, 4 }
 0x690   : > { %2171 = vpow2.f32 %v1213_v33  ;;  %v1223_v14 = vmul.f32 1.442695, %v1201_v34  ;;  %v1185_v23 = vperm.slane %v3048_v61, 6 }
 0x691   : > { %2173 = vpow2.f32 %v1211_v2  ;;  %v1204_v17 = vsub.f32 %v2983_v44, %v1183_v38  ;;  %v1203_v42 = vsub.f32 %v2974_v41, %v1183_v38  ;;  %v1205_v44 = vsub.f32 %v2989_v35, %v1184_v51 }
 0x692   : > { %2175 = vpow2.f32 %v1217_v5  ;;  %v1207_v30 = vsub.f32 %v2995_v47, %v1185_v23  ;;  %v1186_v41 = vperm.slane %v3048_v61, 7  ;;  %v1208_v47 = vsub.f32 %v3001_v60, %v1185_v23 }
 0x693   : > { %2177 = vpow2.f32 %v1215_v20  ;;  %v1229_v18 = vmul.f32 1.442695, %v1204_v17  ;;  %v1227_v19 = vmul.f32 1.442695, %v1203_v42  ;;  %v1231_v22 = vmul.f32 1.442695, %v1205_v44 }
 0x694   : > { %2179 = vpow2.f32 %v1221_v57  ;;  %v1235_v36 = vmul.f32 1.442695, %v1207_v30  ;;  %v1209_v24 = vsub.f32 %v2998_v59, %v1186_v41  ;;  %v1237_v35 = vmul.f32 1.442695, %v1208_v47 }
 0x695   : > { %v3059_v58 = vpop.eup %2169  ;;  %2181 = vpow2.f32 %v1219_v9  ;;  %v1210_v45 = vsub.f32 %v3007_v48, %v1186_v41 }
 0x696   : > { %v3061_v7 = vpop.eup %2171  ;;  %1293 = vperm.xlu0 %2152, %v3059_v58   ;;  %2183 = vpow2.f32 %v1225_v13  ;;  %v1239_v56 = vmul.f32 1.442695, %v1209_v24 }
 0x697   : > { %v3064_v21 = vpop.eup %2173  ;;  %1263 = vperm.xlu2 %2151, %v3061_v7   ;;  %2185 = vpow2.f32 %v1223_v14  ;;  %v1241_v46 = vmul.f32 1.442695, %v1210_v45 }
 0x698   : > { %1260 = vperm.xlu1 %2150, %v3064_v21   ;;  %v3071_v10 = vpop.eup %2175  ;;  %2187 = vpow2.f32 %v1229_v18 }
 0x699   : > { %v3073_v11 = vpop.eup %2177  ;;  %2189 = vpow2.f32 %v1227_v19 }
 0x69a   : > { %v3080_v15 = vpop.eup %2179  ;;  %2191 = vpow2.f32 %v1235_v36 }
 0x69b   : > { %v3082_v16 = vpop.eup %2181  ;;  %2193 = vpow2.f32 %v1231_v22 }
 0x69c   : > { %v3089_v27 = vpop.eup %2183  ;;  %2195 = vpow2.f32 %v1239_v56 }
 0x69d   : > { %v3091_v29 = vpop.eup %2185  ;;  %2197 = vpow2.f32 %v1237_v35 }
 0x69e   : > { %v3098_v40 = vpop.eup %2187  ;;  %2199 = vpow2.f32 %v1241_v46 }
 0x69f   : > { %1269 = vperm.xlu2 %2151, %v3071_v10   ;;  %v3100_v55 = vpop.eup %2189 }
 0x6a0   : > { %1266 = vperm.xlu1 %2150, %v3073_v11   ;;  %v3106_v43 = vpop.eup %2191 }
 0x6a1   : > { %v3108_v25 = vpop.eup %2193 }
 0x6a2   : > { %v3113_v26 = vpop.eup %2195 }
 0x6a3   : > { %v3115_v59 = vpop.eup %2197 }
 0x6a4   : > { %v3119_v60 = vpop.eup %2199 }
 0x6a7   : > { %1275 = vperm.xlu2 %2151, %v3080_v15  }
 0x6a8   : > { %1272 = vperm.xlu1 %2150, %v3082_v16  }
 0x6af   : > { %1281 = vperm.xlu2 %2151, %v3089_v27  }
 0x6b0   : > { %1278 = vperm.xlu1 %2150, %v3091_v29  }
 0x6b7   : > { %1287 = vperm.xlu2 %2151, %v3098_v40  }
 0x6b8   : > { %1284 = vperm.xlu1 %2150, %v3100_v55  }
 0x6bf   : > { %1296 = vperm.xlu2 %2151, %v3106_v43  }
 0x6c0   : > { %1290 = vperm.xlu1 %2150, %v3108_v25  }
 0x6c7   : > { %1302 = vperm.xlu2 %2151, %v3113_v26  }
 0x6c8   : > { %1299 = vperm.xlu1 %2150, %v3115_v59  }
 0x6d0   : > { %1305 = vperm.xlu1 %2150, %v3119_v60  }
 0x6f1   : > { %v1264_v32 = vpop.permute.xlu2 %1263 }
 0x6f2   : > { %v1308_v57 = vperm.slane %v1264_v32, %v3014_v1 }
 0x6f9   : > { %v1270_v50 = vpop.permute.xlu2 %1269 }
 0x6fa   : > { %v1311_v4 = vperm.slane %v1270_v50, %v3014_v1 }
 0x701   : > { %v1276_v51 = vpop.permute.xlu2 %1275 }
 0x702   : > { %v1314_v20 = vperm.slane %v1276_v51, %v3014_v1 }
 0x708   : > { %v1294_v31 = vpop.permute.xlu0 %1293 }
 0x709   : > { %v1282_v52 = vpop.permute.xlu2 %1281  ;;  %v1323_v14 = vperm.slane %v1294_v31, %v3014_v1 }
 0x70a   : > { %v1261_v49 = vpop.permute.xlu1 %1260  ;;  %v1317_v8 = vperm.slane %v1282_v52, %v3014_v1 }
 0x70b   : > { %v1307_v5 = vperm.slane %v1261_v49, %v3011_v62 }
 0x70d   : > { %v1309_v17 = vsel %vm1136_vm10, %v1308_v57, %v1307_v5  ;;  %v1977_v57 = vld [vmem:[#allocation12 + $0x8] sm:$0xff]  }
 0x711   : > { %v1288_v54 = vpop.permute.xlu2 %1287 }
 0x712   : > { %v1267_v61 = vpop.permute.xlu1 %1266  ;;  %v1320_v34 = vperm.slane %v1288_v54, %v3014_v1 }
 0x713   : > { %v1310_v33 = vperm.slane %v1267_v61, %v3011_v62 }
 0x715   : > { %v1312_v9 = vsel %vm1136_vm10, %v1311_v4, %v1310_v33 }
 0x716   : > { %v1331_v18 = vsel %vm1159_vm11, %v1312_v9, %v1309_v17  ;;  %v1978_v9 = vld [vmem:[#allocation12 + $0x10] sm:$0xff]  }
 0x719   : > { %v1297_v0 = vpop.permute.xlu2 %1296 }
 0x71a   : > { %v1273_v48 = vpop.permute.xlu1 %1272  ;;  %v1325_v23 = vperm.slane %v1297_v0, %v3011_v62 }
 0x71b   : > { %v1313_v2 = vperm.slane %v1273_v48, %v3011_v62 }
 0x71d   : > { %v1315_v13 = vsel %vm1136_vm10, %v1314_v20, %v1313_v2 }
 0x71e   : > { %v1332_v44 = vsel %vm1161_vm12, %v1315_v13, %v1331_v18  ;;  %v1949_v13 = vunpack.c.h.bf16 %v1978_v9 }
 0x721   : > { %v1303_v19 = vpop.permute.xlu2 %1302 }
 0x722   : > { %v1279_v37 = vpop.permute.xlu1 %1278  ;;  %v1328_v47 = vperm.slane %v1303_v19, %v3011_v62 }
 0x723   : > { %v1316_v6 = vperm.slane %v1279_v37, %v3011_v62 }
 0x725   : > { %v1318_v42 = vsel %vm1136_vm10, %v1317_v8, %v1316_v6 }
 0x726   : > { %v1333_v41 = vsel %vm1163_vm13, %v1318_v42, %v1332_v44 }
 0x72a   : > { %v1285_v53 = vpop.permute.xlu1 %1284 }
 0x72b   : > { %v1319_v28 = vperm.slane %v1285_v53, %v3011_v62 }
 0x72d   : > { %v1321_v30 = vsel %vm1136_vm10, %v1320_v34, %v1319_v28  ;;  %v1979_v34 = vld [vmem:[#allocation12 + $0x18] sm:$0xff]  }
 0x72e   : > { %v1334_v56 = vsel %vm1165_vm14, %v1321_v30, %v1333_v41  ;;  %v1952_v42 = vunpack.c.l.bf16 %v1979_v34  ;;  %v1953_v30 = vunpack.c.h.bf16 %v1979_v34  ;;  %v1981_v41 = vld [vmem:[#allocation12 + $0x28] sm:$0xff]  }
 0x732   : > { %v1291_v63 = vpop.permute.xlu1 %1290 }
 0x733   : > { %v1322_v12 = vperm.slane %v1291_v63, %v3011_v62 }
 0x735   : > { %v1324_v36 = vsel %vm1136_vm10, %v1323_v14, %v1322_v12  ;;  %v1944_v12 = vunpack.c.l.bf16 %v1977_v57  ;;  %v1948_v14 = vunpack.c.l.bf16 %v1978_v9 }
 0x736   : > { %v1335_v45 = vsel %vm1167_vm15, %v1324_v36, %v1334_v56  ;;  %v1960_v56 = vunpack.c.l.bf16 %v1981_v41 }
 0x73a   : > { %v1300_v3 = vpop.permute.xlu1 %1299 }
 0x73b   : > { %v1326_v38 = vperm.slane %v1300_v3, %v3014_v1 }
 0x73d   : > { %v1327_v22 = vsel %vm1136_vm10, %v1326_v38, %v1325_v23 }
 0x73e   : > { %v1336_v32 = vsel %vm1169_vm0, %v1327_v22, %v1335_v45 }
 0x742   : > { %v1306_v24 = vpop.permute.xlu1 %1305 }
 0x743   : > { %v1329_v35 = vperm.slane %v1306_v24, %v3014_v1 }
 0x745   : > { %v1330_v46 = vsel %vm1136_vm10, %v1329_v35, %v1328_v47  ;;  %v1980_v47 = vld [vmem:[#allocation12 + $0x20] sm:$0xff]  }
 0x746   : > { %v1337_v49 = vsel %vm1171_vm2, %v1330_v46, %v1336_v32 }
 0x747   : > { %v1339_v50 = vsel %vm1174_vm3, %v1337_v49, 0.0  ;;  %v1961_v49 = vunpack.c.h.bf16 %v1981_v41 }
 0x748   : > { %1340 = vadd.xlane.f32.xlu0 %v1339_v50 }
 0x7bb   : > { %v1341_v61 = vpop.xlane.xlu0 %1340 }
 0x7bc   : > { %2201 = vrcp.f32 %v1341_v61 }
 0x7c2   : > { %v2202_v51 = vpop.eup %2201 }
 0x7c3   : > { %v1349_v48 = vperm.slane %v2202_v51, 5  ;;  %v1344_v62 = vperm.slane %v2202_v51, 0  ;;  %v1345_v53 = vperm.slane %v2202_v51, 1  ;;  %v1346_v0 = vperm.slane %v2202_v51, 2 }
 0x7c4   : > { %v1348_v3 = vperm.slane %v2202_v51, 4  ;;  %v1350_v4 = vperm.slane %v2202_v51, 6  ;;  %v1351_v5 = vperm.slane %v2202_v51, 7 }
 0x7c5   : > { %v1371_v52 = vmul.f32 %v3059_v58, %v1349_v48  ;;  %v1361_v1 = vmul.f32 %v3061_v7, %v1344_v62  ;;  %v1360_v37 = vmul.f32 %v3064_v21, %v1344_v62  ;;  %v1363_v54 = vmul.f32 %v3071_v10, %v1345_v53 }
 0x7c6   : > { %v1362_v63 = vmul.f32 %v3073_v11, %v1345_v53  ;;  %v1365_v33 = vmul.f32 %v3080_v15, %v1346_v0  ;;  %v1364_v2 = vmul.f32 %v3082_v16, %v1346_v0  ;;  %v1347_v58 = vperm.slane %v2202_v51, 3 }
 0x7c7   : > { %1465 = vperm.xlu0 %2152, %v1371_v52   ;;  %1415 = vperm.xlu1 %2150, %v1361_v1   ;;  %v1369_v10 = vmul.f32 %v3098_v40, %v1348_v3  ;;  %v1368_v11 = vmul.f32 %v3100_v55, %v1348_v3  ;;  %v1372_v15 = vmul.f32 %v3106_v43, %v1350_v4  ;;  %v1956_v1 = vunpack.c.l.bf16 %v1980_v47 }
 0x7c8   : > { %1410 = vperm.xlu2 %2151, %v1360_v37   ;;  %v1367_v7 = vmul.f32 %v3089_v27, %v1347_v58  ;;  %v1366_v21 = vmul.f32 %v3091_v29, %v1347_v58  ;;  %v1370_v16 = vmul.f32 %v3108_v25, %v1349_v48  ;;  %v1374_v27 = vmul.f32 %v3113_v26, %v1351_v5 }
 0x7c9   : > { %v1373_v29 = vmul.f32 %v3115_v59, %v1350_v4  ;;  %v1593_v40 = vpack.c.bf16 %v2897_v39, %v2897_v39  ;;  %v1375_v55 = vmul.f32 %v3119_v60, %v1351_v5  ;;  %v1945_v26 = vunpack.c.h.bf16 %v1977_v57  ;;  %v1939_v59 = vld [vmem:[#allocation12] sm:$0xff]  }
 0x7ca   : > { %v1941_v38 = vunpack.c.h.bf16 %v1939_v59  ;;  %v1940_v60 = vunpack.c.l.bf16 %v1939_v59 }
 0x7cf   : > { %1425 = vperm.xlu1 %2150, %v1363_v54  }
 0x7d0   : > { %1420 = vperm.xlu2 %2151, %v1362_v63  }
 0x7d7   : > { %1435 = vperm.xlu1 %2150, %v1365_v33  }
 0x7d8   : > { %1430 = vperm.xlu2 %2151, %v1364_v2  }
 0x7df   : > { %1445 = vperm.xlu1 %2150, %v1367_v7   ;;  %v1957_v7 = vunpack.c.h.bf16 %v1980_v47 }
 0x7e0   : > { %1440 = vperm.xlu2 %2151, %v1366_v21  }
 0x7e7   : > { %1455 = vperm.xlu1 %2150, %v1369_v10  }
 0x7e8   : > { %1450 = vperm.xlu2 %2151, %v1368_v11  }
 0x7ef   : > { %1470 = vperm.xlu1 %2150, %v1372_v15   ;;  %v1982_v15 = vld [vmem:[#allocation12 + $0x30] sm:$0xff]  }
 0x7f0   : > { %1460 = vperm.xlu2 %2151, %v1370_v16  }
 0x7f7   : > { %1480 = vperm.xlu1 %2150, %v1374_v27  }
 0x7f8   : > { %1475 = vperm.xlu2 %2151, %v1373_v29  }
 0x7ff   : > { %1595 = vrot.lane.b32.xlu1 %v1593_v40, %s2619_s11  ;;  %s2489_s11 = scalar_lea.hbm %s2488_s20, 4 }
 0x800   : > { %1485 = vperm.xlu2 %2151, %v1375_v55   ;;  %p2490_p1 = scmp.ne.s32.totalorder %s2488_s20, %s2489_s11  ;;  %p2495_p10 = scmp.lt.s32.totalorder %s2493_s1, %s2489_s11 }
 0x802   : > { %p2491_p7 = pnand %p2490_p1, %p2806_p13  ;;  %p2496_p11 = por %p2495_p10, %p2494_p9 }
 0x804   : > { %p2492_p8 = pneg %p2491_p7 }
 0x806   : > { %p2497_p12 = pnand %p2496_p11, %p2492_p8 }
 0x822   : > { %v1411_v43 = vpop.permute.xlu2 %1410 }
 0x823   : > { %v1488_v44 = vmul.f32 %v1940_v60, %v1411_v43  ;;  %v1983_v60 = vld [vmem:[#allocation12 + $0x38] sm:$0xff]  }
 0x825   : > { %v1504_v48 = vsel %vm580_vm1, %v1488_v44, 0.0  ;;  %v1969_v44 = vunpack.c.h.bf16 %v1983_v60 }
 0x82a   : > { %v1421_v6 = vpop.permute.xlu2 %1420 }
 0x82b   : > { %v1490_v18 = vmul.f32 %v1944_v12, %v1421_v6 }
 0x82d   : > { %v1513_v35 = vsel %vm580_vm1, %v1490_v18, 0.0 }
 0x832   : > { %v1431_v25 = vpop.permute.xlu2 %1430 }
 0x833   : > { %v1492_v36 = vmul.f32 %v1948_v14, %v1431_v25  ;;  %v1965_v25 = vunpack.c.h.bf16 %v1982_v15 }
 0x835   : > { %v1522_v62 = vsel %vm580_vm1, %v1492_v36, 0.0 }
 0x839   : > { %v1416_v20 = vpop.permute.xlu1 %1415  ;;  %v1466_v52 = vpop.permute.xlu0 %1465 }
 0x83a   : > { %v1441_v31 = vpop.permute.xlu2 %1440  ;;  %v1489_v19 = vmul.f32 %v1941_v38, %v1416_v20  ;;  %v1499_v2 = vmul.f32 %v1961_v49, %v1466_v52 }
 0x83b   : > { %v1494_v24 = vmul.f32 %v1952_v42, %v1441_v31 }
 0x83c   : > { %v1505_v50 = vsel %vm580_vm1, %v1489_v19, 0.0  ;;  %v1550_v5 = vsel %vm580_vm1, %v1499_v2, 0.0 }
 0x83d   : > { %v1531_v37 = vsel %vm580_vm1, %v1494_v24, 0.0  ;;  %v1506_v0 = vadd.f32 %v1505_v50, %v1504_v48 }
 0x83f   : > { %v1507_v11 = vrot.slane %v1506_v0, 4 }
 0x841   : > { %v1426_v28 = vpop.permute.xlu1 %1425  ;;  %v1508_v31 = vadd.f32 %v1507_v11, %v1506_v0 }
 0x842   : > { %v1451_v8 = vpop.permute.xlu2 %1450  ;;  %v1491_v17 = vmul.f32 %v1945_v26, %v1426_v28 }
 0x843   : > { %v1496_v21 = vmul.f32 %v1956_v1, %v1451_v8  ;;  %v1964_v8 = vunpack.c.l.bf16 %v1982_v15 }
 0x844   : > { %v1514_v22 = vsel %vm580_vm1, %v1491_v17, 0.0 }
 0x845   : > { %v1515_v61 = vadd.f32 %v1514_v22, %v1513_v35  ;;  %v1540_v43 = vsel %vm580_vm1, %v1496_v21, 0.0 }
 0x847   : > { %v1516_v58 = vrot.slane %v1515_v61, 4 }
 0x849   : > { %v1436_v39 = vpop.permute.xlu1 %1435  ;;  %v1517_v27 = vadd.f32 %v1516_v58, %v1515_v61 }
 0x84a   : > { %v1493_v23 = vmul.f32 %v1949_v13, %v1436_v39  ;;  %v1461_v46 = vpop.permute.xlu2 %1460  ;;  %v1509_v13 = vrot.slane %v1508_v31, 2 }
 0x84b   : > { %v1498_v54 = vmul.f32 %v1960_v56, %v1461_v46  ;;  %v1518_v26 = vrot.slane %v1517_v27, 2 }
 0x84c   : > { %v1523_v45 = vsel %vm580_vm1, %v1493_v23, 0.0  ;;  %v1510_v41 = vadd.f32 %v1509_v13, %v1508_v31 }
 0x84d   : > { %v1524_v53 = vadd.f32 %v1523_v45, %v1522_v62  ;;  %v1549_v10 = vsel %vm580_vm1, %v1498_v54, 0.0  ;;  %v1519_v17 = vadd.f32 %v1518_v26, %v1517_v27  ;;  %v1968_v45 = vunpack.c.l.bf16 %v1983_v60 }
 0x84e   : > { %v1551_v40 = vadd.f32 %v1550_v5, %v1549_v10  ;;  %v1511_v61 = vrot.slane %v1510_v41, 1 }
 0x84f   : > { %v1525_v3 = vrot.slane %v1524_v53, 4  ;;  %v1520_v56 = vrot.slane %v1519_v17, 1 }
 0x850   : > { %v1552_v59 = vrot.slane %v1551_v40, 4  ;;  %v1512_v2 = vadd.f32 %v1511_v61, %v1510_v41 }
 0x851   : > { %v1446_v32 = vpop.permute.xlu1 %1445  ;;  %v1526_v6 = vadd.f32 %v1525_v3, %v1524_v53  ;;  %v1521_v52 = vadd.f32 %v1520_v56, %v1519_v17 }
 0x852   : > { %v1495_v51 = vmul.f32 %v1953_v30, %v1446_v32  ;;  %v1476_v55 = vpop.permute.xlu2 %1475  ;;  %v1553_v18 = vadd.f32 %v1552_v59, %v1551_v40  ;;  %v1600_v5 = vpack.c.bf16 %v1512_v2, %v1512_v2 }
 0x853   : > { %v1527_v12 = vrot.slane %v1526_v6, 2  ;;  %v1501_v34 = vmul.f32 %v1965_v25, %v1476_v55  ;;  %v1601_v3 = vpack.c.bf16 %v1521_v52, %v1521_v52 }
 0x854   : > { %v1532_v63 = vsel %vm580_vm1, %v1495_v51, 0.0  ;;  %v1554_v46 = vrot.slane %v1553_v18, 2 }
 0x855   : > { %v1533_v33 = vadd.f32 %v1532_v63, %v1531_v37  ;;  %v1528_v19 = vadd.f32 %v1527_v12, %v1526_v6  ;;  %v1559_v30 = vsel %vm580_vm1, %v1501_v34, 0.0  ;;  %v1584_v6 = vsel %vm1159_vm11, %v1521_v52, %v1512_v2 }
 0x856   : > { %v1555_v53 = vadd.f32 %v1554_v46, %v1553_v18  ;;  %v1617_v25 = vunpack.c.l.b16 %v1601_v3 }
 0x857   : > { %v1534_v4 = vrot.slane %v1533_v33, 4  ;;  %v1529_v49 = vrot.slane %v1528_v19, 1 }
 0x858   : > { %v1556_v11 = vrot.slane %v1555_v53, 1 }
 0x859   : > { %v1456_v16 = vpop.permute.xlu1 %1455  ;;  %v1535_v28 = vadd.f32 %v1534_v4, %v1533_v33  ;;  %v1530_v63 = vadd.f32 %v1529_v49, %v1528_v19 }
 0x85a   : > { %v1497_v29 = vmul.f32 %v1957_v7, %v1456_v16  ;;  %v1486_v24 = vpop.permute.xlu2 %1485 }
 0x85b   : > { %v1536_v39 = vrot.slane %v1535_v28, 2  ;;  %v1503_v50 = vmul.f32 %v1969_v44, %v1486_v24  ;;  %v1602_v16 = vpack.c.bf16 %v1530_v63, %v1530_v63 }
 0x85c   : > { %v1541_v20 = vsel %vm580_vm1, %v1497_v29, 0.0 }
 0x85d   : > { %v1542_v57 = vadd.f32 %v1541_v20, %v1540_v43  ;;  %v1537_v22 = vadd.f32 %v1536_v39, %v1535_v28  ;;  %v1568_v0 = vsel %vm580_vm1, %v1503_v50, 0.0  ;;  %v1557_v20 = vadd.f32 %v1556_v11, %v1555_v53 }
 0x85f   : > { %v1543_v9 = vrot.slane %v1542_v57, 4  ;;  %v1538_v51 = vrot.slane %v1537_v22, 1 }
 0x861   : > { %v1544_v38 = vadd.f32 %v1543_v9, %v1542_v57  ;;  %v1471_v14 = vpop.permute.xlu1 %1470  ;;  %v1539_v58 = vadd.f32 %v1538_v51, %v1537_v22 }
 0x862   : > { %v1500_v42 = vmul.f32 %v1964_v8, %v1471_v14 }
 0x863   : > { %v1545_v23 = vrot.slane %v1544_v38, 2  ;;  %v1603_v27 = vpack.c.bf16 %v1539_v58, %v1539_v58 }
 0x864   : > { %v1558_v36 = vsel %vm580_vm1, %v1500_v42, 0.0 }
 0x865   : > { %v1560_v47 = vadd.f32 %v1559_v30, %v1558_v36  ;;  %v1546_v35 = vadd.f32 %v1545_v23, %v1544_v38 }
 0x867   : > { %v1561_v32 = vrot.slane %v1560_v47, 4  ;;  %v1547_v1 = vrot.slane %v1546_v35, 1 }
 0x869   : > { %v1562_v48 = vadd.f32 %v1561_v32, %v1560_v47  ;;  %v1481_v62 = vpop.permute.xlu1 %1480  ;;  %v1548_v10 = vadd.f32 %v1547_v1, %v1546_v35 }
 0x86a   : > { %v1502_v37 = vmul.f32 %v1968_v45, %v1481_v62 }
 0x86b   : > { %v1563_v54 = vrot.slane %v1562_v48, 2  ;;  %v1604_v55 = vpack.c.bf16 %v1548_v10, %v1548_v10 }
 0x86c   : > { %v1567_v33 = vsel %vm580_vm1, %v1502_v37, 0.0 }
 0x86d   : > { %v1564_v7 = vadd.f32 %v1563_v54, %v1562_v48  ;;  %v1569_v21 = vadd.f32 %v1568_v0, %v1567_v33 }
 0x86f   : > { %v1565_v4 = vrot.slane %v1564_v7, 1  ;;  %v1570_v15 = vrot.slane %v1569_v21, 4 }
 0x871   : > { %v1571_v29 = vadd.f32 %v1570_v15, %v1569_v21  ;;  %v1596_v40 = vpop.permute.xlu1 %1595  ;;  %v1566_v43 = vadd.f32 %v1565_v4, %v1564_v7 }
 0x872   : > { %1599 = vst.msk [vmem:[%s552_s24] sm:$0xf] %vm1598_vm4, %v1596_v40 }
 0x873   : > { %v1572_v31 = vrot.slane %v1571_v29, 2 }
 0x874   : > { %2500 = shalt.err (!%p2497_p12)
}
 0x875   : > { %2018 = dma.vmem_to_hbm [thread:$0]  (%p2806_p13), %s1654_s19, 64, %s1656_s12, %s1635_s25   ;;  %v1585_v28 = vsel %vm1161_vm12, %v1530_v63, %v1584_v6  ;;  %v1618_v57 = vunpack.c.l.b16 %v1602_v16  ;;  %v1616_v26 = vunpack.c.l.b16 %v1600_v5  ;;  %v1619_v59 = vunpack.c.l.b16 %v1603_v27 }
 0x876   : > { %v1586_v8 = vsel %vm1163_vm13, %v1539_v58, %v1585_v28  ;;  %v1573_v9 = vadd.f32 %v1572_v31, %v1571_v29  ;;  %v1620_v34 = vunpack.c.l.b16 %v1604_v55  ;;  %v1606_v13 = vpack.c.bf16 %v1566_v43, %v1566_v43  ;;  %s3302_s19 = sld [smem:[#allocation36_spill]]  ;;  %s3303_s25 = scalar_lea.vmem [#allocation23], %s2829_s2 }
 0x877   : > { %v1587_v12 = vsel %vm1165_vm14, %v1548_v10, %v1586_v8  ;;  %v1624_v39 = vsel %vm1159_vm11, %v1617_v25, %v1616_v26  ;;  %v1605_v38 = vpack.c.bf16 %v1557_v20, %v1557_v20  ;;  %s1668_s20 = sshll.u32 %s3303_s25, 4  ;;  %s3304_s16 = smov %s3303_s25  ;;  %s1669_s20 = int_to_ptr.vmem [resolvable:$true] %s1668_s20 }
 0x878   : > { %v1574_v60 = vrot.slane %v1573_v9, 1  ;;  %v1625_v14 = vsel %vm1161_vm12, %v1618_v57, %v1624_v39  ;;  %v1588_v17 = vsel %vm1167_vm15, %v1557_v20, %v1587_v12  ;;  %v1622_v19 = vunpack.c.l.b16 %v1606_v13 }
 0x879   : > { %v1626_v18 = vsel %vm1163_vm13, %v1619_v59, %v1625_v14  ;;  %v1589_v23 = vsel %vm1169_vm0, %v1566_v43, %v1588_v17  ;;  %v1621_v44 = vunpack.c.l.b16 %v1605_v38 }
 0x87a   : > { %v1575_v42 = vadd.f32 %v1574_v60, %v1573_v9  ;;  %v1627_v30 = vsel %vm1165_vm14, %v1620_v34, %v1626_v18 }
 0x87b   : > { %v1628_v24 = vsel %vm1167_vm15, %v1621_v44, %v1627_v30 }
 0x87c   : > { %s1666_s12 = scalar_lea.hbm %s3302_s19, %s1902_s10  ;;  %v1590_v36 = vsel %vm1171_vm2, %v1575_v42, %v1589_v23  ;;  %v1607_v41 = vpack.c.bf16 %v1575_v42, %v1575_v42  ;;  %v1629_v47 = vsel %vm1169_vm0, %v1622_v19, %v1628_v24  ;;  %s1640_s10 = scalar_lea.sflag [#allocation24], %s2826_s21 }
 0x87d   : > { %1592 = vst.msk [vmem:[#allocation6] sm:$0xff] %vm580_vm1, %v1590_v36  ;;  %s1670_s11 = sshll.u32 %s1666_s12, 4  ;;  %s2521_s24 = scalar_lea.hbm %s3302_s19, 32  ;;  %s1671_s11 = int_to_ptr.hbm [resolvable:$true] %s1670_s11 }
 0x87e   : > { %v1623_v22 = vunpack.c.l.b16 %v1607_v41  ;;  %s2515_s3 = sshra.s32 %s1671_s11, 4  ;;  %s2516_s3 = int_to_ptr.hbm [resolvable:$true] %s2515_s3 }
 0x87f   : > { %s2517_s29 = scalar_lea.hbm %s2516_s3, 4  ;;  %p2522_p6 = scmp.lt.s32.totalorder %s2516_s3, %s3302_s19 }
 0x880   : > { %v1630_v56 = vsel %vm1171_vm2, %v1623_v22, %v1629_v47  ;;  %p2518_p0 = scmp.ne.s32.totalorder %s2516_s3, %s2517_s29  ;;  %p2523_p3 = scmp.lt.s32.totalorder %s2521_s24, %s2517_s29 }
 0x881   : > { %v1631_v35 = vpack.c.b16 %v1630_v56, %v1630_v56 }
 0x882   : > { %p2519_p2 = pnand %p2518_p0, %p2806_p13  ;;  %p2524_p1 = por %p2523_p3, %p2522_p6 }
 0x883   : > { %1633 = vst.msk [vmem:[%s3304_s16] sm:$0xf] %vm1598_vm4, %v1631_v35 }
 0x884   : > { %p2520_p5 = pneg %p2519_p2 }
 0x886   : > { %p2525_p7 = pnand %p2524_p1, %p2520_p5 }
 0x888   : > { %2528 = shalt.err (!%p2525_p7)
}
 0x889   : > { %2019 = dma.vmem_to_hbm [thread:$0]  (%p2806_p13), %s1669_s20, 64, %s1671_s11, %s1640_s10  }
 0x88a PF: > { %p2075_p8 = scmp.ge.s32.totalorder %s2603_s18, 2  ;;  %s1682_s2 = sand.u32 1, %s2583_s13  }
 0x88b   : > { %s1683_s21 = scalar_lea.sflag [#allocation9], %s1682_s2 }
 0x88c   : > { %p2052_p9 = pnand %p2075_p8, %p2813_p4 }
 0x88e   : > { %p2053_p10 = pneg %p2052_p9 }
 0x890   : > { %2574 = dma.done.wait (%p2053_p10), %s1683_s21, 64  }
 0x891   : > { %2576 = vsyncadd (%p2053_p10), %s1683_s21, 4294967232  ;;  %s1693_s25 = scalar_lea.sflag [#allocation24], %s1682_s2 }
 0x892   : > { %2578 = dma.done.wait (%p2053_p10), %s1693_s25, 64  }
 0x893   : > { %2580 = vsyncadd (%p2053_p10), %s1693_s25, 4294967232  ;;  %s34_s18 = sadd.s32 1, %s2603_s18   ;;  %s3305_s13 = smov %s2587_s14 }
 0x894   : > { %p31_p11 = scmp.ge.s32.totalorder %s34_s18, 10   ;;  %s3306_s14 = smov %s2591_s15 }
 0x895   : > { %s3307_s15 = smov %s2811_s9  ;;  %s3308_s16 = smov %s2599_s17 }
 0x896   : > { %s3309_s17 = smov %s3311_s28  ;;  %33 = sbr.rel (!%p31_p11) target bundleno = 18 (0x12), region = 157 }
 0x89b   :  { %1699 = vsyncpa [#allocation8], 1 }
 0x89c   :  { %1701 = vsyncpa [#allocation8 + $0x1], 1 }
 0x89d   :  { %1702 = vsyncpa [#allocation11], 1 }
 0x89e   :  { %1703 = vsyncpa [#allocation14], 1 }
 0x89f   :  { %1704 = vsyncpa [#allocation17], 1 }
 0x8a0   :  { %1705 = vsyncpa [#allocation20], 1 }
 0x8a1   :  { %1706 = vsyncpa [#allocation9], 1 }
 0x8a2   :  { %1708 = vsyncpa [#allocation9 + $0x1], 1 }
 0x8a3   :  { %1709 = vsyncpa [#allocation24], 1 }
 0x8a4   :  { %1711 = vsyncpa [#allocation24 + $0x1], 1 }

</bundles_post_ra>
